<compile_context>
chip_gen: v7x
topology: tpu7x:2x2x1
jax: 0.10.0
libtpu: 0.0.40
codegen_flags: <defaults>
</compile_context>

<pallas_src>
import numpy as np
import jax
import jax.numpy as jnp
from jax.experimental import pallas as pl
from jax.experimental.pallas import tpu as pltpu

H = 100          # torch hidden_size
HP = 128         # padded hidden (lane width)
G4 = 4 * HP      # packed gate width  [i | f | o | g]
HP3 = 3 * HP     # contiguous sigmoid slab width


def _make_kernel(seq_len: int):
    def lstm_kernel(x_ref, wih_ref, whh_ref, b_ref, wlin_ref, blin_ref, out_ref):
        # Weights stay resident for the whole recurrence.
        wih_row = wih_ref[...]          # (1, 4*HP) f32   (input_size == 1)
        b_row = b_ref[...]              # (1, 4*HP) f32   (b_ih + b_hh folded)
        whh = whh_ref[...]              # (HP, 4*HP) bf16 recurrent weights

        h = jnp.zeros((1, HP), jnp.float32)
        c = jnp.zeros((1, HP), jnp.float32)

        # Fully unrolled recurrence (seq_len is static & small): static
        # indexing, full LLO scheduling visibility across steps.
        # TODO(synk): for long sequences switch to lax.fori_loop(..., unroll=8)
        # to bound code size; VMEM usage is already O(1) in seq_len.
        for t in range(seq_len):
            # Rank-1 input projection with the bias folded in; independent of
            # h/c, so it overlaps the previous step's MXU/EUP work.
            gx = x_ref[t] * wih_row + b_row                        # (1, 4*HP) f32
            # Recurrent matmul: bf16 operands, f32 accumulation (MXU-native).
            gates = gx + jnp.dot(h.astype(jnp.bfloat16), whh,
                                 preferred_element_type=jnp.float32)
            # Gates packed [i | f | o | g]: one sigmoid slab + one tanh slab.
            ifo = jax.nn.sigmoid(gates[:, 0:HP3])                  # (1, 3*HP)
            g = jnp.tanh(gates[:, HP3:G4])                         # (1, HP)
            i_g = ifo[:, 0:HP]
            f_g = ifo[:, HP:2 * HP]
            o_g = ifo[:, 2 * HP:HP3]
            c = f_g * c + i_g * g
            h = o_g * jnp.tanh(c)

        # Final Linear(hidden_size -> output_size); result lives in lane 0.
        pred = (jnp.dot(h, wlin_ref[...], preferred_element_type=jnp.float32)
                + blin_ref[...])                                   # (1, HP)
        out_ref[...] = jnp.broadcast_to(pred, out_ref.shape)

    return lstm_kernel


def _reorder_gates(p, axis=0):
    """torch packs LSTM gates as [i, f, g, o]; repack as [i, f, o, g]."""
    i, f, g, o = jnp.split(p, 4, axis=axis)
    return jnp.concatenate([i, f, o, g], axis=axis)


def _pad_gate_cols(w_t):
    """(K, 4*H) -> (K, 4*HP): zero-pad each gate block to 128 lanes."""
    K = w_t.shape[0]
    w_t = w_t.reshape(K, 4, H)
    w_t = jnp.pad(w_t, ((0, 0), (0, 0), (0, HP - H)))
    return w_t.reshape(K, 4 * HP)


def lstm_forward(x, w_ih, w_hh, b_ih, b_hh, w_lin, b_lin):
    """Pallas forward matching LSTMnetwork.forward(seq) -> pred[-1] (shape (1,))."""
    L = int(x.shape[0])

    # ---- repack parameters to the kernel layout (plain JAX glue) ------------
    wih_row = _pad_gate_cols(_reorder_gates(w_ih, 0).T)            # (1, 4*HP) f32
    whh_p = _pad_gate_cols(_reorder_gates(w_hh, 0).T)              # (H, 4*HP)
    whh_p = jnp.pad(whh_p, ((0, HP - H), (0, 0))).astype(jnp.bfloat16)  # (HP, 4*HP) bf16
    b_p = _pad_gate_cols(
        _reorder_gates(b_ih + b_hh, 0).reshape(1, 4 * H))          # (1, 4*HP) f32

    wlin_p = jnp.pad(w_lin.T, ((0, HP - H), (0, HP - 1)))          # (HP, HP)
    blin_p = jnp.pad(b_lin.reshape(1, 1), ((0, 0), (0, HP - 1)))   # (1, HP)

    x_smem = x.astype(jnp.float32).reshape(L)                      # (L,) scalars -> SMEM

    kernel = _make_kernel(L)

    grid_spec = pltpu.PrefetchScalarGridSpec(
        num_scalar_prefetch=0,
        grid=(1,),
        in_specs=[
            pl.BlockSpec(memory_space=pltpu.MemorySpace.SMEM),     # x scalars
            pl.BlockSpec((1, G4), lambda i: (0, 0)),               # W_ih row
            pl.BlockSpec((HP, G4), lambda i: (0, 0)),              # W_hh (bf16)
            pl.BlockSpec((1, G4), lambda i: (0, 0)),               # b_ih + b_hh
            pl.BlockSpec((HP, HP), lambda i: (0, 0)),              # W_lin
            pl.BlockSpec((1, HP), lambda i: (0, 0)),               # b_lin
        ],
        out_specs=pl.BlockSpec((8, HP), lambda i: (0, 0)),
    )

    out = pl.pallas_call(
        kernel,
        out_shape=jax.ShapeDtypeStruct((8, HP), jnp.float32),
        grid_spec=grid_spec,
        compiler_params=pltpu.CompilerParams(
            dimension_semantics=("arbitrary",)),
    )(x_smem, wih_row, whh_p, b_p, wlin_p, blin_p)

    return out[0, 0:1]   # == pred[-1], shape (output_size,) = (1,)


def lstm_ref(x, w_ih, w_hh, b_ih, b_hh, w_lin, b_lin,
             recurrent_dtype=jnp.float32):
    """Pure-JAX reference mirroring torch.nn.LSTM + Linear semantics.

    recurrent_dtype=jnp.bfloat16 mirrors the kernel's bf16 MXU operands
    (with f32 accumulation) for a tight-tolerance comparison.
    """
    L = x.shape[0]
    h = jnp.zeros((1, H), jnp.float32)
    c = jnp.zeros((1, H), jnp.float32)
    whh_t = w_hh.T.astype(recurrent_dtype)
    for t in range(L):
        gx = x[t] * w_ih.T + b_ih + b_hh                           # (1, 4*H)
        gates = gx + jnp.dot(h.astype(recurrent_dtype), whh_t,
                             preferred_element_type=jnp.float32)
        i = jax.nn.sigmoid(gates[:, 0 * H:1 * H])
        f = jax.nn.sigmoid(gates[:, 1 * H:2 * H])
        g = jnp.tanh(gates[:, 2 * H:3 * H])
        o = jax.nn.sigmoid(gates[:, 3 * H:4 * H])
        c = f * c + i * g
        h = o * jnp.tanh(c)
    return (h @ w_lin.T + b_lin)[0]


if __name__ == "__main__":
    L = 8  # sequence length
    key = jax.random.PRNGKey(0)
    ks = jax.random.split(key, 7)
    bound = 1.0 / np.sqrt(H)

    # Deterministic parameter init (same shapes as the torch module).
    w_ih = jax.random.uniform(ks[0], (4 * H, 1), jnp.float32, -bound, bound)
    w_hh = jax.random.uniform(ks[1], (4 * H, H), jnp.float32, -bound, bound)
    b_ih = jax.random.uniform(ks[2], (4 * H,), jnp.float32, -bound, bound)
    b_hh = jax.random.uniform(ks[3], (4 * H,), jnp.float32, -bound, bound)
    w_lin = jax.random.uniform(ks[4], (1, H), jnp.float32, -bound, bound)
    b_lin = jax.random.uniform(ks[5], (1,), jnp.float32, -bound, bound)

    x = jax.random.normal(ks[6], (L,), jnp.float32)  # 1-D sequence like torch usage

    pred = jax.block_until_ready(
        lstm_forward(x, w_ih, w_hh, b_ih, b_hh, w_lin, b_lin))

    # Tight check vs a reference matching the kernel's bf16 recurrent matmul.
    ref_bf16 = lstm_ref(x, w_ih, w_hh, b_ih, b_hh, w_lin, b_lin,
                        recurrent_dtype=jnp.bfloat16)
    np.testing.assert_allclose(np.asarray(pred), np.asarray(ref_bf16),
                               rtol=1e-4, atol=1e-4)

    # Looser sanity check vs the full-f32 (torch-semantics) reference.
    ref_f32 = lstm_ref(x, w_ih, w_hh, b_ih, b_hh, w_lin, b_lin,
                       recurrent_dtype=jnp.float32)
    np.testing.assert_allclose(np.asarray(pred), np.asarray(ref_f32),
                               rtol=2e-2, atol=2e-2)

    print("KERNEL_OK")
</pallas_src>

<mosaic_0001>
module attributes {stable_mosaic.version = 11 : i64} {
  func.func @lstm_kernel(%arg0: i32, %arg1: memref<8xf32, #tpu.memory_space<smem>>, %arg2: memref<1x512xf32, #tpu.memory_space<vmem>>, %arg3: memref<128x512xbf16, #tpu.memory_space<vmem>>, %arg4: memref<1x512xf32, #tpu.memory_space<vmem>>, %arg5: memref<128x128xf32, #tpu.memory_space<vmem>>, %arg6: memref<1x128xf32, #tpu.memory_space<vmem>>, %arg7: memref<8x128xf32, #tpu.memory_space<vmem>>) attributes {dimension_semantics = [#tpu.dimension_semantics<arbitrary>], iteration_bounds = array<i64: 1>, scalar_prefetch = 0 : i64, scratch_operands = 0 : i64, tpu.core_type = #tpu.core_type<tc>, window_params = [{transform_indices = @transform_0, window_bounds = array<i64: 8>}, {pipeline_mode = #tpu.pipeline_mode<synchronous>, transform_indices = @transform_1, window_bounds = array<i64: 1, 512>}, {pipeline_mode = #tpu.pipeline_mode<synchronous>, transform_indices = @transform_2, window_bounds = array<i64: 128, 512>}, {pipeline_mode = #tpu.pipeline_mode<synchronous>, transform_indices = @transform_3, window_bounds = array<i64: 1, 512>}, {pipeline_mode = #tpu.pipeline_mode<synchronous>, transform_indices = @transform_4, window_bounds = array<i64: 128, 128>}, {pipeline_mode = #tpu.pipeline_mode<synchronous>, transform_indices = @transform_5, window_bounds = array<i64: 1, 128>}, {pipeline_mode = #tpu.pipeline_mode<synchronous>, transform_indices = @transform_6, window_bounds = array<i64: 8, 128>}]} {
    %c0 = arith.constant 0 : index
    %c0_0 = arith.constant 0 : index
    %0 = vector.load %arg2[%c0, %c0_0] : memref<1x512xf32, #tpu.memory_space<vmem>>, vector<1x512xf32>
    %c0_1 = arith.constant 0 : index
    %c0_2 = arith.constant 0 : index
    %1 = vector.load %arg4[%c0_1, %c0_2] : memref<1x512xf32, #tpu.memory_space<vmem>>, vector<1x512xf32>
    %c0_3 = arith.constant 0 : index
    %c0_4 = arith.constant 0 : index
    %2 = vector.load %arg3[%c0_3, %c0_4] : memref<128x512xbf16, #tpu.memory_space<vmem>>, vector<128x512xbf16>
    %cst = arith.constant 0.000000e+00 : f32
    %3 = vector.broadcast %cst : f32 to vector<1x128xf32>
    %cst_5 = arith.constant 0.000000e+00 : f32
    %4 = vector.broadcast %cst_5 : f32 to vector<1x128xf32>
    %c0_6 = arith.constant 0 : index
    %5 = memref.load %arg1[%c0_6] : memref<8xf32, #tpu.memory_space<smem>>
    %6 = vector.broadcast %5 : f32 to vector<1x512xf32>
    %7 = arith.mulf %6, %0 : vector<1x512xf32>
    %8 = arith.addf %7, %1 : vector<1x512xf32>
    %9 = arith.truncf %3 : vector<1x128xf32> to vector<1x128xbf16>
    %cst_7 = arith.constant dense<0.000000e+00> : vector<1x512xf32>
    %10 = tpu.matmul %9, %2, %cst_7 {dimension_numbers = #tpu.dot_dimension_numbers<[1], [0], [0], [1], [0, 0, 1, 1], [], []>} : vector<1x128xbf16>, vector<128x512xbf16>, vector<1x512xf32> -> vector<1x512xf32>
    %11 = arith.addf %8, %10 : vector<1x512xf32>
    %12 = vector.extract_strided_slice %11 {offsets = [0, 0], sizes = [1, 384], strides = [1, 1]} : vector<1x512xf32> to vector<1x384xf32>
    %13 = arith.negf %12 : vector<1x384xf32>
    %14 = math.exp %13 : vector<1x384xf32>
    %cst_8 = arith.constant 1.000000e+00 : f32
    %15 = vector.broadcast %cst_8 : f32 to vector<1x384xf32>
    %16 = arith.addf %15, %14 : vector<1x384xf32>
    %17 = arith.divf %15, %16 : vector<1x384xf32>
    %18 = vector.extract_strided_slice %11 {offsets = [0, 384], sizes = [1, 128], strides = [1, 1]} : vector<1x512xf32> to vector<1x128xf32>
    %19 = math.tanh %18 : vector<1x128xf32>
    %20 = vector.extract_strided_slice %17 {offsets = [0, 0], sizes = [1, 128], strides = [1, 1]} : vector<1x384xf32> to vector<1x128xf32>
    %21 = vector.extract_strided_slice %17 {offsets = [0, 128], sizes = [1, 128], strides = [1, 1]} : vector<1x384xf32> to vector<1x128xf32>
    %22 = vector.extract_strided_slice %17 {offsets = [0, 256], sizes = [1, 128], strides = [1, 1]} : vector<1x384xf32> to vector<1x128xf32>
    %23 = arith.mulf %21, %4 : vector<1x128xf32>
    %24 = arith.mulf %20, %19 : vector<1x128xf32>
    %25 = arith.addf %23, %24 : vector<1x128xf32>
    %26 = math.tanh %25 : vector<1x128xf32>
    %27 = arith.mulf %22, %26 : vector<1x128xf32>
    %c1 = arith.constant 1 : index
    %28 = memref.load %arg1[%c1] : memref<8xf32, #tpu.memory_space<smem>>
    %29 = vector.broadcast %28 : f32 to vector<1x512xf32>
    %30 = arith.mulf %29, %0 : vector<1x512xf32>
    %31 = arith.addf %30, %1 : vector<1x512xf32>
    %32 = arith.truncf %27 : vector<1x128xf32> to vector<1x128xbf16>
    %cst_9 = arith.constant dense<0.000000e+00> : vector<1x512xf32>
    %33 = tpu.matmul %32, %2, %cst_9 {dimension_numbers = #tpu.dot_dimension_numbers<[1], [0], [0], [1], [0, 0, 1, 1], [], []>} : vector<1x128xbf16>, vector<128x512xbf16>, vector<1x512xf32> -> vector<1x512xf32>
    %34 = arith.addf %31, %33 : vector<1x512xf32>
    %35 = vector.extract_strided_slice %34 {offsets = [0, 0], sizes = [1, 384], strides = [1, 1]} : vector<1x512xf32> to vector<1x384xf32>
    %36 = arith.negf %35 : vector<1x384xf32>
    %37 = math.exp %36 : vector<1x384xf32>
    %cst_10 = arith.constant 1.000000e+00 : f32
    %38 = vector.broadcast %cst_10 : f32 to vector<1x384xf32>
    %39 = arith.addf %38, %37 : vector<1x384xf32>
    %40 = arith.divf %38, %39 : vector<1x384xf32>
    %41 = vector.extract_strided_slice %34 {offsets = [0, 384], sizes = [1, 128], strides = [1, 1]} : vector<1x512xf32> to vector<1x128xf32>
    %42 = math.tanh %41 : vector<1x128xf32>
    %43 = vector.extract_strided_slice %40 {offsets = [0, 0], sizes = [1, 128], strides = [1, 1]} : vector<1x384xf32> to vector<1x128xf32>
    %44 = vector.extract_strided_slice %40 {offsets = [0, 128], sizes = [1, 128], strides = [1, 1]} : vector<1x384xf32> to vector<1x128xf32>
    %45 = vector.extract_strided_slice %40 {offsets = [0, 256], sizes = [1, 128], strides = [1, 1]} : vector<1x384xf32> to vector<1x128xf32>
    %46 = arith.mulf %44, %25 : vector<1x128xf32>
    %47 = arith.mulf %43, %42 : vector<1x128xf32>
    %48 = arith.addf %46, %47 : vector<1x128xf32>
    %49 = math.tanh %48 : vector<1x128xf32>
    %50 = arith.mulf %45, %49 : vector<1x128xf32>
    %c2 = arith.constant 2 : index
    %51 = memref.load %arg1[%c2] : memref<8xf32, #tpu.memory_space<smem>>
    %52 = vector.broadcast %51 : f32 to vector<1x512xf32>
    %53 = arith.mulf %52, %0 : vector<1x512xf32>
    %54 = arith.addf %53, %1 : vector<1x512xf32>
    %55 = arith.truncf %50 : vector<1x128xf32> to vector<1x128xbf16>
    %cst_11 = arith.constant dense<0.000000e+00> : vector<1x512xf32>
    %56 = tpu.matmul %55, %2, %cst_11 {dimension_numbers = #tpu.dot_dimension_numbers<[1], [0], [0], [1], [0, 0, 1, 1], [], []>} : vector<1x128xbf16>, vector<128x512xbf16>, vector<1x512xf32> -> vector<1x512xf32>
    %57 = arith.addf %54, %56 : vector<1x512xf32>
    %58 = vector.extract_strided_slice %57 {offsets = [0, 0], sizes = [1, 384], strides = [1, 1]} : vector<1x512xf32> to vector<1x384xf32>
    %59 = arith.negf %58 : vector<1x384xf32>
    %60 = math.exp %59 : vector<1x384xf32>
    %cst_12 = arith.constant 1.000000e+00 : f32
    %61 = vector.broadcast %cst_12 : f32 to vector<1x384xf32>
    %62 = arith.addf %61, %60 : vector<1x384xf32>
    %63 = arith.divf %61, %62 : vector<1x384xf32>
    %64 = vector.extract_strided_slice %57 {offsets = [0, 384], sizes = [1, 128], strides = [1, 1]} : vector<1x512xf32> to vector<1x128xf32>
    %65 = math.tanh %64 : vector<1x128xf32>
    %66 = vector.extract_strided_slice %63 {offsets = [0, 0], sizes = [1, 128], strides = [1, 1]} : vector<1x384xf32> to vector<1x128xf32>
    %67 = vector.extract_strided_slice %63 {offsets = [0, 128], sizes = [1, 128], strides = [1, 1]} : vector<1x384xf32> to vector<1x128xf32>
    %68 = vector.extract_strided_slice %63 {offsets = [0, 256], sizes = [1, 128], strides = [1, 1]} : vector<1x384xf32> to vector<1x128xf32>
    %69 = arith.mulf %67, %48 : vector<1x128xf32>
    %70 = arith.mulf %66, %65 : vector<1x128xf32>
    %71 = arith.addf %69, %70 : vector<1x128xf32>
    %72 = math.tanh %71 : vector<1x128xf32>
    %73 = arith.mulf %68, %72 : vector<1x128xf32>
    %c3 = arith.constant 3 : index
    %74 = memref.load %arg1[%c3] : memref<8xf32, #tpu.memory_space<smem>>
    %75 = vector.broadcast %74 : f32 to vector<1x512xf32>
    %76 = arith.mulf %75, %0 : vector<1x512xf32>
    %77 = arith.addf %76, %1 : vector<1x512xf32>
    %78 = arith.truncf %73 : vector<1x128xf32> to vector<1x128xbf16>
    %cst_13 = arith.constant dense<0.000000e+00> : vector<1x512xf32>
    %79 = tpu.matmul %78, %2, %cst_13 {dimension_numbers = #tpu.dot_dimension_numbers<[1], [0], [0], [1], [0, 0, 1, 1], [], []>} : vector<1x128xbf16>, vector<128x512xbf16>, vector<1x512xf32> -> vector<1x512xf32>
    %80 = arith.addf %77, %79 : vector<1x512xf32>
    %81 = vector.extract_strided_slice %80 {offsets = [0, 0], sizes = [1, 384], strides = [1, 1]} : vector<1x512xf32> to vector<1x384xf32>
    %82 = arith.negf %81 : vector<1x384xf32>
    %83 = math.exp %82 : vector<1x384xf32>
    %cst_14 = arith.constant 1.000000e+00 : f32
    %84 = vector.broadcast %cst_14 : f32 to vector<1x384xf32>
    %85 = arith.addf %84, %83 : vector<1x384xf32>
    %86 = arith.divf %84, %85 : vector<1x384xf32>
    %87 = vector.extract_strided_slice %80 {offsets = [0, 384], sizes = [1, 128], strides = [1, 1]} : vector<1x512xf32> to vector<1x128xf32>
    %88 = math.tanh %87 : vector<1x128xf32>
    %89 = vector.extract_strided_slice %86 {offsets = [0, 0], sizes = [1, 128], strides = [1, 1]} : vector<1x384xf32> to vector<1x128xf32>
    %90 = vector.extract_strided_slice %86 {offsets = [0, 128], sizes = [1, 128], strides = [1, 1]} : vector<1x384xf32> to vector<1x128xf32>
    %91 = vector.extract_strided_slice %86 {offsets = [0, 256], sizes = [1, 128], strides = [1, 1]} : vector<1x384xf32> to vector<1x128xf32>
    %92 = arith.mulf %90, %71 : vector<1x128xf32>
    %93 = arith.mulf %89, %88 : vector<1x128xf32>
    %94 = arith.addf %92, %93 : vector<1x128xf32>
    %95 = math.tanh %94 : vector<1x128xf32>
    %96 = arith.mulf %91, %95 : vector<1x128xf32>
    %c4 = arith.constant 4 : index
    %97 = memref.load %arg1[%c4] : memref<8xf32, #tpu.memory_space<smem>>
    %98 = vector.broadcast %97 : f32 to vector<1x512xf32>
    %99 = arith.mulf %98, %0 : vector<1x512xf32>
    %100 = arith.addf %99, %1 : vector<1x512xf32>
    %101 = arith.truncf %96 : vector<1x128xf32> to vector<1x128xbf16>
    %cst_15 = arith.constant dense<0.000000e+00> : vector<1x512xf32>
    %102 = tpu.matmul %101, %2, %cst_15 {dimension_numbers = #tpu.dot_dimension_numbers<[1], [0], [0], [1], [0, 0, 1, 1], [], []>} : vector<1x128xbf16>, vector<128x512xbf16>, vector<1x512xf32> -> vector<1x512xf32>
    %103 = arith.addf %100, %102 : vector<1x512xf32>
    %104 = vector.extract_strided_slice %103 {offsets = [0, 0], sizes = [1, 384], strides = [1, 1]} : vector<1x512xf32> to vector<1x384xf32>
    %105 = arith.negf %104 : vector<1x384xf32>
    %106 = math.exp %105 : vector<1x384xf32>
    %cst_16 = arith.constant 1.000000e+00 : f32
    %107 = vector.broadcast %cst_16 : f32 to vector<1x384xf32>
    %108 = arith.addf %107, %106 : vector<1x384xf32>
    %109 = arith.divf %107, %108 : vector<1x384xf32>
    %110 = vector.extract_strided_slice %103 {offsets = [0, 384], sizes = [1, 128], strides = [1, 1]} : vector<1x512xf32> to vector<1x128xf32>
    %111 = math.tanh %110 : vector<1x128xf32>
    %112 = vector.extract_strided_slice %109 {offsets = [0, 0], sizes = [1, 128], strides = [1, 1]} : vector<1x384xf32> to vector<1x128xf32>
    %113 = vector.extract_strided_slice %109 {offsets = [0, 128], sizes = [1, 128], strides = [1, 1]} : vector<1x384xf32> to vector<1x128xf32>
    %114 = vector.extract_strided_slice %109 {offsets = [0, 256], sizes = [1, 128], strides = [1, 1]} : vector<1x384xf32> to vector<1x128xf32>
    %115 = arith.mulf %113, %94 : vector<1x128xf32>
    %116 = arith.mulf %112, %111 : vector<1x128xf32>
    %117 = arith.addf %115, %116 : vector<1x128xf32>
    %118 = math.tanh %117 : vector<1x128xf32>
    %119 = arith.mulf %114, %118 : vector<1x128xf32>
    %c5 = arith.constant 5 : index
    %120 = memref.load %arg1[%c5] : memref<8xf32, #tpu.memory_space<smem>>
    %121 = vector.broadcast %120 : f32 to vector<1x512xf32>
    %122 = arith.mulf %121, %0 : vector<1x512xf32>
    %123 = arith.addf %122, %1 : vector<1x512xf32>
    %124 = arith.truncf %119 : vector<1x128xf32> to vector<1x128xbf16>
    %cst_17 = arith.constant dense<0.000000e+00> : vector<1x512xf32>
    %125 = tpu.matmul %124, %2, %cst_17 {dimension_numbers = #tpu.dot_dimension_numbers<[1], [0], [0], [1], [0, 0, 1, 1], [], []>} : vector<1x128xbf16>, vector<128x512xbf16>, vector<1x512xf32> -> vector<1x512xf32>
    %126 = arith.addf %123, %125 : vector<1x512xf32>
    %127 = vector.extract_strided_slice %126 {offsets = [0, 0], sizes = [1, 384], strides = [1, 1]} : vector<1x512xf32> to vector<1x384xf32>
    %128 = arith.negf %127 : vector<1x384xf32>
    %129 = math.exp %128 : vector<1x384xf32>
    %cst_18 = arith.constant 1.000000e+00 : f32
    %130 = vector.broadcast %cst_18 : f32 to vector<1x384xf32>
    %131 = arith.addf %130, %129 : vector<1x384xf32>
    %132 = arith.divf %130, %131 : vector<1x384xf32>
    %133 = vector.extract_strided_slice %126 {offsets = [0, 384], sizes = [1, 128], strides = [1, 1]} : vector<1x512xf32> to vector<1x128xf32>
    %134 = math.tanh %133 : vector<1x128xf32>
    %135 = vector.extract_strided_slice %132 {offsets = [0, 0], sizes = [1, 128], strides = [1, 1]} : vector<1x384xf32> to vector<1x128xf32>
    %136 = vector.extract_strided_slice %132 {offsets = [0, 128], sizes = [1, 128], strides = [1, 1]} : vector<1x384xf32> to vector<1x128xf32>
    %137 = vector.extract_strided_slice %132 {offsets = [0, 256], sizes = [1, 128], strides = [1, 1]} : vector<1x384xf32> to vector<1x128xf32>
    %138 = arith.mulf %136, %117 : vector<1x128xf32>
    %139 = arith.mulf %135, %134 : vector<1x128xf32>
    %140 = arith.addf %138, %139 : vector<1x128xf32>
    %141 = math.tanh %140 : vector<1x128xf32>
    %142 = arith.mulf %137, %141 : vector<1x128xf32>
    %c6 = arith.constant 6 : index
    %143 = memref.load %arg1[%c6] : memref<8xf32, #tpu.memory_space<smem>>
    %144 = vector.broadcast %143 : f32 to vector<1x512xf32>
    %145 = arith.mulf %144, %0 : vector<1x512xf32>
    %146 = arith.addf %145, %1 : vector<1x512xf32>
    %147 = arith.truncf %142 : vector<1x128xf32> to vector<1x128xbf16>
    %cst_19 = arith.constant dense<0.000000e+00> : vector<1x512xf32>
    %148 = tpu.matmul %147, %2, %cst_19 {dimension_numbers = #tpu.dot_dimension_numbers<[1], [0], [0], [1], [0, 0, 1, 1], [], []>} : vector<1x128xbf16>, vector<128x512xbf16>, vector<1x512xf32> -> vector<1x512xf32>
    %149 = arith.addf %146, %148 : vector<1x512xf32>
    %150 = vector.extract_strided_slice %149 {offsets = [0, 0], sizes = [1, 384], strides = [1, 1]} : vector<1x512xf32> to vector<1x384xf32>
    %151 = arith.negf %150 : vector<1x384xf32>
    %152 = math.exp %151 : vector<1x384xf32>
    %cst_20 = arith.constant 1.000000e+00 : f32
    %153 = vector.broadcast %cst_20 : f32 to vector<1x384xf32>
    %154 = arith.addf %153, %152 : vector<1x384xf32>
    %155 = arith.divf %153, %154 : vector<1x384xf32>
    %156 = vector.extract_strided_slice %149 {offsets = [0, 384], sizes = [1, 128], strides = [1, 1]} : vector<1x512xf32> to vector<1x128xf32>
    %157 = math.tanh %156 : vector<1x128xf32>
    %158 = vector.extract_strided_slice %155 {offsets = [0, 0], sizes = [1, 128], strides = [1, 1]} : vector<1x384xf32> to vector<1x128xf32>
    %159 = vector.extract_strided_slice %155 {offsets = [0, 128], sizes = [1, 128], strides = [1, 1]} : vector<1x384xf32> to vector<1x128xf32>
    %160 = vector.extract_strided_slice %155 {offsets = [0, 256], sizes = [1, 128], strides = [1, 1]} : vector<1x384xf32> to vector<1x128xf32>
    %161 = arith.mulf %159, %140 : vector<1x128xf32>
    %162 = arith.mulf %158, %157 : vector<1x128xf32>
    %163 = arith.addf %161, %162 : vector<1x128xf32>
    %164 = math.tanh %163 : vector<1x128xf32>
    %165 = arith.mulf %160, %164 : vector<1x128xf32>
    %c7 = arith.constant 7 : index
    %166 = memref.load %arg1[%c7] : memref<8xf32, #tpu.memory_space<smem>>
    %167 = vector.broadcast %166 : f32 to vector<1x512xf32>
    %168 = arith.mulf %167, %0 : vector<1x512xf32>
    %169 = arith.addf %168, %1 : vector<1x512xf32>
    %170 = arith.truncf %165 : vector<1x128xf32> to vector<1x128xbf16>
    %cst_21 = arith.constant dense<0.000000e+00> : vector<1x512xf32>
    %171 = tpu.matmul %170, %2, %cst_21 {dimension_numbers = #tpu.dot_dimension_numbers<[1], [0], [0], [1], [0, 0, 1, 1], [], []>} : vector<1x128xbf16>, vector<128x512xbf16>, vector<1x512xf32> -> vector<1x512xf32>
    %172 = arith.addf %169, %171 : vector<1x512xf32>
    %173 = vector.extract_strided_slice %172 {offsets = [0, 0], sizes = [1, 384], strides = [1, 1]} : vector<1x512xf32> to vector<1x384xf32>
    %174 = arith.negf %173 : vector<1x384xf32>
    %175 = math.exp %174 : vector<1x384xf32>
    %cst_22 = arith.constant 1.000000e+00 : f32
    %176 = vector.broadcast %cst_22 : f32 to vector<1x384xf32>
    %177 = arith.addf %176, %175 : vector<1x384xf32>
    %178 = arith.divf %176, %177 : vector<1x384xf32>
    %179 = vector.extract_strided_slice %172 {offsets = [0, 384], sizes = [1, 128], strides = [1, 1]} : vector<1x512xf32> to vector<1x128xf32>
    %180 = math.tanh %179 : vector<1x128xf32>
    %181 = vector.extract_strided_slice %178 {offsets = [0, 0], sizes = [1, 128], strides = [1, 1]} : vector<1x384xf32> to vector<1x128xf32>
    %182 = vector.extract_strided_slice %178 {offsets = [0, 128], sizes = [1, 128], strides = [1, 1]} : vector<1x384xf32> to vector<1x128xf32>
    %183 = vector.extract_strided_slice %178 {offsets = [0, 256], sizes = [1, 128], strides = [1, 1]} : vector<1x384xf32> to vector<1x128xf32>
    %184 = arith.mulf %182, %163 : vector<1x128xf32>
    %185 = arith.mulf %181, %180 : vector<1x128xf32>
    %186 = arith.addf %184, %185 : vector<1x128xf32>
    %187 = math.tanh %186 : vector<1x128xf32>
    %188 = arith.mulf %183, %187 : vector<1x128xf32>
    %c0_23 = arith.constant 0 : index
    %c0_24 = arith.constant 0 : index
    %189 = vector.load %arg5[%c0_23, %c0_24] : memref<128x128xf32, #tpu.memory_space<vmem>>, vector<128x128xf32>
    %cst_25 = arith.constant dense<0.000000e+00> : vector<1x128xf32>
    %190 = tpu.matmul %188, %189, %cst_25 {dimension_numbers = #tpu.dot_dimension_numbers<[1], [0], [0], [1], [0, 0, 1, 1], [], []>} : vector<1x128xf32>, vector<128x128xf32>, vector<1x128xf32> -> vector<1x128xf32>
    %c0_26 = arith.constant 0 : index
    %c0_27 = arith.constant 0 : index
    %191 = vector.load %arg6[%c0_26, %c0_27] : memref<1x128xf32, #tpu.memory_space<vmem>>, vector<1x128xf32>
    %192 = arith.addf %190, %191 : vector<1x128xf32>
    %193 = vector.shape_cast %192 : vector<1x128xf32> to vector<1x128xf32>
    %194 = vector.broadcast %193 : vector<1x128xf32> to vector<8x128xf32>
    %c0_28 = arith.constant 0 : index
    %c0_29 = arith.constant 0 : index
    %195 = vector.load %arg7[%c0_28, %c0_29] : memref<8x128xf32, #tpu.memory_space<vmem>>, vector<8x128xf32>
    tpu.vector_store %arg7[%c0_28, %c0_29], %194 {strides = array<i32>} : memref<8x128xf32, #tpu.memory_space<vmem>>, vector<8x128xf32>,
    return
  }
  func.func @transform_0(%arg0: i32) -> i32 {
    %c0_i32 = arith.constant 0 : i32
    %c0_i32_0 = arith.constant 0 : i32
    return %c0_i32 : i32
  }
  func.func @transform_1(%arg0: i32) -> (i32, i32) {
    %c0_i32 = arith.constant 0 : i32
    %c0_i32_0 = arith.constant 0 : i32
    %c0_i32_1 = arith.constant 0 : i32
    return %c0_i32, %c0_i32_0 : i32, i32
  }
  func.func @transform_2(%arg0: i32) -> (i32, i32) {
    %c0_i32 = arith.constant 0 : i32
    %c0_i32_0 = arith.constant 0 : i32
    %c0_i32_1 = arith.constant 0 : i32
    return %c0_i32, %c0_i32_0 : i32, i32
  }
  func.func @transform_3(%arg0: i32) -> (i32, i32) {
    %c0_i32 = arith.constant 0 : i32
    %c0_i32_0 = arith.constant 0 : i32
    %c0_i32_1 = arith.constant 0 : i32
    return %c0_i32, %c0_i32_0 : i32, i32
  }
  func.func @transform_4(%arg0: i32) -> (i32, i32) {
    %c0_i32 = arith.constant 0 : i32
    %c0_i32_0 = arith.constant 0 : i32
    %c0_i32_1 = arith.constant 0 : i32
    return %c0_i32, %c0_i32_0 : i32, i32
  }
  func.func @transform_5(%arg0: i32) -> (i32, i32) {
    %c0_i32 = arith.constant 0 : i32
    %c0_i32_0 = arith.constant 0 : i32
    %c0_i32_1 = arith.constant 0 : i32
    return %c0_i32, %c0_i32_0 : i32, i32
  }
  func.func @transform_6(%arg0: i32) -> (i32, i32) {
    %c0_i32 = arith.constant 0 : i32
    %c0_i32_0 = arith.constant 0 : i32
    %c0_i32_1 = arith.constant 0 : i32
    return %c0_i32, %c0_i32_0 : i32, i32
  }
}

</mosaic_0001>

<bundles_post_ra>
// kernel: tpu_custom_call.1
= control target key start
LH: loop header
LB: loop body
LE: loop exit
PB: predicated region body
PF: predicated region fallthrough
CT: control target
= control target key end

     0   :  { %11 = vsyncpa [#allocation5], 0  ;;  %s2369_s0 = inlined_call_operand.hbm [shape: f32[8], index: 0, kind: input, shape index: {}]   ;;  %s2370_s1 = inlined_call_operand.hbm [shape: f32[1,512], index: 1, kind: input, shape index: {}]   ;;  %s2371_s2 = inlined_call_operand.hbm [shape: bf16[128,512], index: 2, kind: input, shape index: {}]   ;;  %s2372_s3 = inlined_call_operand.vmem [shape: f32[1,512], index: 3, kind: input, shape index: {}]   ;;  %s2373_s4 = inlined_call_operand.hbm [shape: f32[128,128], index: 4, kind: input, shape index: {}]   ;;  %s2374_s5 = inlined_call_operand.vmem [shape: f32[1,128], index: 5, kind: input, shape index: {}]   ;;  %s2375_s6 = inlined_call_operand.hbm [shape: f32[8,128], index: 6, kind: output, shape index: {}]  }
   0x1   :  { %12 = vsyncpa [#allocation3], 0 }
   0x2   :  { %13 = vsyncpa [#allocation8], 0 }
   0x3   :  { %14 = vsyncpa [#allocation4], 0  ;;  %s1846_s21 = smov [#allocation7]   ;;  %s1740_s25 = scalar_lea.hbm %s2371_s2, 4096 }
   0x4   :  { %s38_s22 = sshll.u32 %s1846_s21, 4  ;;  %p1741_p0 = scmp.ne.s32.totalorder %s2371_s2, %s1740_s25  ;;  %s39_s22 = int_to_ptr.vmem [resolvable:$true] %s38_s22 }
   0x5   :  { %p1744_p1 = scmp.lt.u32.totalorder %s1740_s25, %s2371_s2 }
   0x7   :  { %p1746_p2 = pnand %p1744_p1, %p1741_p0 }
   0x9   :  { %1749 = shalt.err (!%p1746_p2)
}
   0xa   :  { %s1750_s30 = scalar_lea.vmem %s39_s22, 4096  ;;  %p1755_p4 = scmp.lt.s32.totalorder %s39_s22, %s39_s22 }
   0xb   :  { %p1751_p3 = scmp.ne.s32.totalorder %s39_s22, %s1750_s30  ;;  %p1756_p5 = scmp.lt.s32.totalorder %s1750_s30, %s1750_s30 }
   0xd   :  { %p1757_p6 = por %p1756_p5, %p1755_p4 }
   0xf   :  { %p1758_p7 = pnand %p1757_p6, %p1751_p3 }
  0x11   :  { %1761 = shalt.err (!%p1758_p7)
}
  0x12   :  { %s1847_s7 = smov 256   ;;  %s1848_s8 = smov 16  }
  0x13   :  { %44 = dma.hbm_to_vmem [thread:$0]  %s2371_s2, 4096, %s39_s22, [#allocation8], %s1847_s7, %s1847_s7, %s1848_s8  }
  0x14   :  { %s1762_s13 = scalar_lea.hbm %s2369_s0, 16 }
  0x15   :  { %p1763_p8 = scmp.ne.s32.totalorder %s2369_s0, %s1762_s13  ;;  %p1766_p9 = scmp.lt.u32.totalorder %s1762_s13, %s2369_s0 }
  0x17   :  { %p1768_p10 = pnand %p1766_p9, %p1763_p8 }
  0x19   :  { %1771 = shalt.err (!%p1768_p10)
}
  0x1a   :  { %s1849_s18 = smov [#allocation2]   ;;  %s1850_s2 = smov [#allocation6]  }
  0x1b   :  { %22 = dma.hbm_to_smem %s2369_s0, 16, %s1849_s18, [#allocation5]  }
  0x1c   :  { %s29_s21 = sshll.u32 %s1850_s2, 4  ;;  %s1851_s22 = smov [#allocation9]   ;;  %s30_s21 = int_to_ptr.vmem [resolvable:$true] %s29_s21 }
  0x1d   :  { %s52_s23 = sshll.u32 %s1851_s22, 4  ;;  %s1772_s26 = scalar_lea.hbm %s2370_s1, 64  ;;  %s1919_s23 = int_to_ptr.vmem [resolvable:$true] %s52_s23 }
  0x1e   :  { %p1773_p11 = scmp.ne.s32.totalorder %s2370_s1, %s1772_s26  ;;  %p1776_p12 = scmp.lt.u32.totalorder %s1772_s26, %s2370_s1 }
  0x20   :  { %p1778_p13 = pnand %p1776_p12, %p1773_p11 }
  0x22   :  { %1781 = shalt.err (!%p1778_p13)
}
  0x23   :  { %s1782_s0 = scalar_lea.vmem %s30_s21, 64  ;;  %p1787_p1 = scmp.lt.s32.totalorder %s30_s21, %s30_s21 }
  0x24   :  { %p1783_p0 = scmp.ne.s32.totalorder %s30_s21, %s1782_s0  ;;  %p1788_p2 = scmp.lt.s32.totalorder %s1782_s0, %s1782_s0 }
  0x26   :  { %p1789_p3 = por %p1788_p2, %p1787_p1 }
  0x28   :  { %p1790_p4 = pnand %p1789_p3, %p1783_p0 }
  0x2a   :  { %1793 = shalt.err (!%p1790_p4)
}
  0x2b   :  { %32 = dma.hbm_to_vmem [thread:$0]  %s2370_s1, 64, %s30_s21, [#allocation3]  }
  0x2c   :  { %s1794_s11 = scalar_lea.hbm %s2373_s4, 2048 }
  0x2d   :  { %p1795_p5 = scmp.ne.s32.totalorder %s2373_s4, %s1794_s11  ;;  %p1798_p6 = scmp.lt.u32.totalorder %s1794_s11, %s2373_s4 }
  0x2f   :  { %p1800_p7 = pnand %p1798_p6, %p1795_p5 }
  0x31   :  { %1803 = shalt.err (!%p1800_p7)
}
  0x32   :  { %s1804_s16 = scalar_lea.vmem %s1919_s23, 2048  ;;  %p1809_p9 = scmp.lt.s32.totalorder %s1919_s23, %s1919_s23 }
  0x33   :  { %p1805_p8 = scmp.ne.s32.totalorder %s1919_s23, %s1804_s16  ;;  %p1810_p10 = scmp.lt.s32.totalorder %s1804_s16, %s1804_s16 }
  0x35   :  { %p1811_p11 = por %p1810_p10, %p1809_p9 }
  0x37   :  { %p1812_p12 = pnand %p1811_p11, %p1805_p8 }
  0x39   :  { %1815 = shalt.err (!%p1812_p12)
}
  0x3a   :  { %s1852_s1 = smov 128   ;;  %s1853_s17 = smov 8  }
  0x3b   :  { %58 = dma.hbm_to_vmem [thread:$0]  %s2373_s4, 2048, %s1919_s23, [#allocation8], %s1852_s1, %s1852_s1, %s1853_s17  }
  0x3c   :  { %1838 = dma.done.wait [#allocation5], 16  }
  0x3d   :  { %1839 = vsyncadd [#allocation5], 4294967280 }
  0x3e   :  { %1840 = dma.done.wait [#allocation3], 64  }
  0x3f   :  { %1841 = vsyncadd [#allocation3], 4294967232 }
  0x40   :  { %1842 = dma.done.wait [#allocation8], 6144  }
  0x41   :  { %1843 = vsyncadd [#allocation8], 4294961152 }
  0x42   :  { %73 = sfence }
  0x43   :  { %v1950_v0 = vld [vmem:[#allocation7 + $0x4] ss:$16 sps:$4 sm:$0xff]   ;;  %v1952_v1 = vld [vmem:[#allocation7 + $0xc] ss:$16 sps:$4 sm:$0xff]   ;;  %v1854_v2 = vmov 0   ;;  %s109_s4 = sld [smem:[#allocation2]]  ;;  %v364_v35 = vlaneseq }
  0x44   :  { %305 = vmatprep.mubr.bf16.mxu0 %v1854_v2  ;;  %346 = vmatprep.mubr.bf16.mxu1 %v1854_v2  ;;  %v1957_v3 = vld [vmem:[#allocation7] ss:$16 sps:$4 sm:$0xff]   ;;  %v1959_v4 = vld [vmem:[#allocation7 + $0x8] ss:$16 sps:$4 sm:$0xff]   ;;  %v1962_v5 = vld [vmem:[#allocation7 + $0x24] ss:$16 sps:$4 sm:$0xff]  }
  0x45   :  { %273 = vmatprep.subr.bf16.mxu0 %v1950_v0  ;;  %314 = vmatprep.subr.bf16.mxu1 %v1952_v1  ;;  %v1966_v6 = vld [vmem:[#allocation7 + $0x2c] ss:$16 sps:$4 sm:$0xff]   ;;  %v1968_v7 = vld [vmem:[#allocation7 + $0x20] ss:$16 sps:$4 sm:$0xff]   ;;  %v1971_v8 = vld [vmem:[#allocation7 + $0x28] ss:$16 sps:$4 sm:$0xff]  }
  0x46   :  { %274 = vmatpush1.bf16.msra.mxu0 %v1957_v3  ;;  %315 = vmatpush1.bf16.msra.mxu1 %v1959_v4  ;;  %v1974_v9 = vld [vmem:[#allocation7 + $0x44] ss:$16 sps:$4 sm:$0xff]   ;;  %v1976_v10 = vld [vmem:[#allocation7 + $0x4c] ss:$16 sps:$4 sm:$0xff]   ;;  %v1978_v11 = vld [vmem:[#allocation7 + $0x40] ss:$16 sps:$4 sm:$0xff]  }
  0x47   :  { %275 = vmatprep.subr.bf16.mxu0 %v1962_v5  ;;  %316 = vmatprep.subr.bf16.mxu1 %v1966_v6  ;;  %v1980_v12 = vld [vmem:[#allocation7 + $0x48] ss:$16 sps:$4 sm:$0xff]   ;;  %v1984_v13 = vld [vmem:[#allocation7 + $0x64] ss:$16 sps:$4 sm:$0xff]   ;;  %v1988_v14 = vld [vmem:[#allocation7 + $0x6c] ss:$16 sps:$4 sm:$0xff]  }
  0x48   :  { %v1990_v15 = vld [vmem:[#allocation7 + $0x60] ss:$16 sps:$4 sm:$0xff]   ;;  %v1994_v16 = vld [vmem:[#allocation7 + $0x68] ss:$16 sps:$4 sm:$0xff]   ;;  %v1996_v17 = vld [vmem:[#allocation7 + $0x84] ss:$16 sps:$4 sm:$0xff]  }
  0x49   :  { %v2000_v18 = vld [vmem:[#allocation7 + $0x8c] ss:$16 sps:$4 sm:$0xff]   ;;  %v2002_v19 = vld [vmem:[#allocation7 + $0x80] ss:$16 sps:$4 sm:$0xff]   ;;  %v2004_v20 = vld [vmem:[#allocation7 + $0x88] ss:$16 sps:$4 sm:$0xff]   ;;  %v110_v39 = vstv %s109_s4 }
  0x4a   :  { %276 = vmatpush1.bf16.msra.mxu0 %v1968_v7  ;;  %317 = vmatpush1.bf16.msra.mxu1 %v1971_v8  ;;  %v2008_v21 = vld [vmem:[#allocation7 + $0xa4] ss:$16 sps:$4 sm:$0xff]   ;;  %v2012_v22 = vld [vmem:[#allocation7 + $0xac] ss:$16 sps:$4 sm:$0xff]   ;;  %v2016_v23 = vld [vmem:[#allocation7 + $0xa0] ss:$16 sps:$4 sm:$0xff]  }
  0x4b   :  { %277 = vmatprep.subr.bf16.mxu0 %v1974_v9  ;;  %318 = vmatprep.subr.bf16.mxu1 %v1976_v10  ;;  %v2018_v24 = vld [vmem:[#allocation7 + $0xa8] ss:$16 sps:$4 sm:$0xff]   ;;  %v2022_v25 = vld [vmem:[#allocation7 + $0xc4] ss:$16 sps:$4 sm:$0xff]   ;;  %v2024_v26 = vld [vmem:[#allocation7 + $0xcc] ss:$16 sps:$4 sm:$0xff]  }
  0x4c   :  { %v2028_v27 = vld [vmem:[#allocation7 + $0xc0] ss:$16 sps:$4 sm:$0xff]   ;;  %v2030_v28 = vld [vmem:[#allocation7 + $0xc8] ss:$16 sps:$4 sm:$0xff]   ;;  %v2034_v29 = vld [vmem:[#allocation7 + $0xe4] ss:$16 sps:$4 sm:$0xff]  }
  0x4d   :  { %v2036_v30 = vld [vmem:[#allocation7 + $0xec] ss:$16 sps:$4 sm:$0xff]   ;;  %v2040_v31 = vld [vmem:[#allocation7 + $0xe0] ss:$16 sps:$4 sm:$0xff]   ;;  %v2042_v32 = vld [vmem:[#allocation7 + $0xe8] ss:$16 sps:$4 sm:$0xff]  }
  0x4e   :  { %278 = vmatpush1.bf16.msra.mxu0 %v1978_v11  ;;  %319 = vmatpush1.bf16.msra.mxu1 %v1980_v12  ;;  %v1855_v33 = vmov 1966171168   ;;  %v2086_v37 = vshrl.u32 %v364_v35, 7  ;;  %v2088_v38 = vld [vmem:[#allocation6] sm:$0xf]  ;;  %s1506_s21 = sld [smem:[#allocation2 + $0x1]] }
  0x4f   :  { %279 = vmatprep.subr.bf16.mxu0 %v1984_v13  ;;  %320 = vmatprep.subr.bf16.mxu1 %v1988_v14  ;;  %v362_v34 = vunpack.c.l.s4 %v1855_v33  ;;  %v111_v46 = vmul.f32 %v110_v39, %v2088_v38  ;;  %v2097_v50 = vld [vmem:[%s2372_s3] sm:$0xf]  ;;  %s1508_s22 = sld [smem:[#allocation2 + $0x2]]  ;;  %s1510_s23 = sld [smem:[#allocation2 + $0x3]]  ;;  %vm1857_vm0 = vmmov 0  }
  0x50   :  { %s1512_s24 = sld [smem:[#allocation2 + $0x4]]  ;;  %s1514_s25 = sld [smem:[#allocation2 + $0x5]] }
  0x51   :  { %v363_v36 = vunpack.c.0.s8 %v362_v34  ;;  %v112_v55 = vadd.f32 %v111_v46, %v2097_v50  ;;  %s1516_s26 = sld [smem:[#allocation2 + $0x6]]  ;;  %s1518_s27 = sld [smem:[#allocation2 + $0x7]] }
  0x52   :  { %280 = vmatpush1.bf16.msra.mxu0 %v1990_v15  ;;  %321 = vmatpush1.bf16.msra.mxu1 %v1994_v16  ;;  %s1859_s0 = smov [#allocation10]  }
  0x53   :  { %281 = vmatprep.subr.bf16.mxu0 %v1996_v17  ;;  %322 = vmatprep.subr.bf16.mxu1 %v2000_v18  ;;  %v2091_v42 = vsub.s32 %v363_v36, %v2086_v37  ;;  %s1462_s7 = sshll.u32 %s1859_s0, 4  ;;  %s1463_s7 = int_to_ptr.vmem [resolvable:$true] %s1462_s7 }
  0x54   :  { %s1816_s8 = scalar_lea.vmem %s1463_s7, 128  ;;  %p1821_p0 = scmp.lt.s32.totalorder %s1463_s7, %s1463_s7 }
  0x55   :  { %p1817_p13 = scmp.ne.s32.totalorder %s1463_s7, %s1816_s8  ;;  %p1822_p1 = scmp.lt.s32.totalorder %s1816_s8, %s1816_s8 }
  0x56   :  { %282 = vmatpush1.bf16.msra.mxu0 %v2002_v19  ;;  %323 = vmatpush1.bf16.msra.mxu1 %v2004_v20 }
  0x57   :  { %283 = vmatprep.subr.bf16.mxu0 %v2008_v21  ;;  %324 = vmatprep.subr.bf16.mxu1 %v2012_v22  ;;  %p1823_p2 = por %p1822_p1, %p1821_p0 }
  0x59   :  { %p1824_p3 = pnand %p1823_p2, %p1817_p13 }
  0x5a   :  { %284 = vmatpush1.bf16.msra.mxu0 %v2016_v23  ;;  %325 = vmatpush1.bf16.msra.mxu1 %v2018_v24 }
  0x5b   :  { %285 = vmatprep.subr.bf16.mxu0 %v2022_v25  ;;  %326 = vmatprep.subr.bf16.mxu1 %v2024_v26 }
  0x5e   :  { %286 = vmatpush1.bf16.msra.mxu0 %v2028_v27  ;;  %327 = vmatpush1.bf16.msra.mxu1 %v2030_v28 }
  0x5f   :  { %287 = vmatprep.subr.bf16.mxu0 %v2034_v29  ;;  %328 = vmatprep.subr.bf16.mxu1 %v2036_v30 }
  0x62   :  { %288 = vmatpush1.bf16.msra.mxu0 %v2040_v31  ;;  %329 = vmatpush1.bf16.msra.mxu1 %v2042_v32 }
  0x63   :  { %410 = vmatprep.subr.bf16.mxu0 %v1950_v0  ;;  %451 = vmatprep.subr.bf16.mxu1 %v1952_v1 }
  0x65   :  { %306 = vmatmul.mubr.bf16.vlgmr.msra.gmra.mrb[0].mxu0 %v1854_v2  ;;  %347 = vmatmul.mubr.bf16.vlgmr.msra.gmra.mrb[0].mxu1 %v1854_v2 }
  0x66   :  { %411 = vmatpush1.bf16.msra.mxu0 %v1957_v3  ;;  %452 = vmatpush1.bf16.msra.mxu1 %v1959_v4 }
  0x67   :  { %412 = vmatprep.subr.bf16.mxu0 %v1962_v5  ;;  %453 = vmatprep.subr.bf16.mxu1 %v1966_v6 }
  0x68   :  { %442 = vmatprep.mubr.bf16.mxu0 %v1854_v2  ;;  %483 = vmatprep.mubr.bf16.mxu1 %v1854_v2 }
  0x6a   :  { %413 = vmatpush1.bf16.msra.mxu0 %v1968_v7  ;;  %454 = vmatpush1.bf16.msra.mxu1 %v1971_v8 }
  0x6b   :  { %414 = vmatprep.subr.bf16.mxu0 %v1974_v9  ;;  %455 = vmatprep.subr.bf16.mxu1 %v1976_v10 }
  0x6e   :  { %415 = vmatpush1.bf16.msra.mxu0 %v1978_v11  ;;  %456 = vmatpush1.bf16.msra.mxu1 %v1980_v12 }
  0x6f   :  { %416 = vmatprep.subr.bf16.mxu0 %v1984_v13  ;;  %457 = vmatprep.subr.bf16.mxu1 %v1988_v14 }
  0x72   :  { %417 = vmatpush1.bf16.msra.mxu0 %v1990_v15  ;;  %458 = vmatpush1.bf16.msra.mxu1 %v1994_v16 }
  0x73   :  { %418 = vmatprep.subr.bf16.mxu0 %v1996_v17  ;;  %459 = vmatprep.subr.bf16.mxu1 %v2000_v18 }
  0x76   :  { %419 = vmatpush1.bf16.msra.mxu0 %v2002_v19  ;;  %460 = vmatpush1.bf16.msra.mxu1 %v2004_v20 }
  0x77   :  { %420 = vmatprep.subr.bf16.mxu0 %v2008_v21  ;;  %461 = vmatprep.subr.bf16.mxu1 %v2012_v22 }
  0x7a   :  { %421 = vmatpush1.bf16.msra.mxu0 %v2016_v23  ;;  %462 = vmatpush1.bf16.msra.mxu1 %v2018_v24 }
  0x7b   :  { %422 = vmatprep.subr.bf16.mxu0 %v2022_v25  ;;  %463 = vmatprep.subr.bf16.mxu1 %v2024_v26 }
  0x7e   :  { %423 = vmatpush1.bf16.msra.mxu0 %v2028_v27  ;;  %464 = vmatpush1.bf16.msra.mxu1 %v2030_v28 }
  0x7f   :  { %424 = vmatprep.subr.bf16.mxu0 %v2034_v29  ;;  %465 = vmatprep.subr.bf16.mxu1 %v2036_v30 }
  0x82   :  { %425 = vmatpush1.bf16.msra.mxu0 %v2040_v31  ;;  %466 = vmatpush1.bf16.msra.mxu1 %v2042_v32 }
  0x83   :  { %547 = vmatprep.subr.bf16.mxu0 %v1950_v0  ;;  %588 = vmatprep.subr.bf16.mxu1 %v1952_v1 }
 0x138   :  { %v307_v40 = vpop.f32.mrb[0].mxu0  ;;  %v348_v41 = vpop.f32.mrb[0].mxu1 }
 0x139   :  { %v309_v43 = vpop.f32.mrb[1].mxu0  ;;  %v350_v44 = vpop.f32.mrb[1].mxu1 }
 0x13a   :  { %v359_v45 = vcombine.low %v307_v40, %v309_v43  ;;  %v360_v47 = vcombine.low %v348_v41, %v350_v44  ;;  %v311_v48 = vpop.f32.mrb[2].mxu0  ;;  %v352_v49 = vpop.f32.mrb[2].mxu1 }
 0x13b   :  { %v312_v51 = vpop.f32.mrb[3].mxu0  ;;  %v353_v52 = vpop.f32.mrb[3].mxu1 }
 0x13c   :  { %v367_v53 = vrot.slane %v359_v45, %v2091_v42  ;;  %v374_v54 = vrot.slane %v360_v47, %v2091_v42  ;;  %v406_v45 = vstv %s1506_s21 }
 0x13d   :  { %v407_v52 = vmul.f32 %v406_v45, %v2088_v38 }
 0x13e   :  { %v375_v56 = vcombine.low %v367_v53, %v374_v54 }
 0x140   :  { %v382_v57 = vrot.slane %v375_v56, %v2091_v42 }
 0x142   :  { %v384_v58 = vadd.f32 %v382_v57, %v112_v55 }
 0x144   :  { %v1505_v59 = vmul.f32 -1.442695, %v384_v58  ;;  %v392_v62 = vrot.slane %v384_v58, 3 }
 0x146   :  { %1658 = vpow2.f32 %v1505_v59 }
 0x150   :  { %v1659_v60 = vpop.eup %1658 }
 0x151   :  { %v388_v61 = vadd.f32 1.0, %v1659_v60  ;;  %v408_v60 = vadd.f32 %v407_v52, %v2097_v50 }
 0x153   :  { %1660 = vrcp.f32 %v388_v61 }
 0x154   :  { %1662 = vtanh.f32 %v392_v62 }
 0x15d   :  { %v1661_v63 = vpop.eup %1660 }
 0x15e   :  { %v396_v33 = vrot.slane %v1661_v63, 1  ;;  %v1663_v34 = vpop.eup %1662  ;;  %v402_v40 = vrot.slane %v1661_v63, 2 }
 0x15f   :  { %v399_v35 = vmul.f32 %v1663_v34, %v1661_v63 }
 0x160   :  { %v398_v36 = vmul.f32 0.0, %v396_v33 }
 0x162   :  { %v2103_v39 = vadd.f32 %v399_v35, %v398_v36 }
 0x164   :  { %1664 = vtanh.f32 %v2103_v39 }
 0x16e   :  { %v1665_v41 = vpop.eup %1664 }
 0x16f   :  { %v404_v43 = vmul.f32 %v1665_v41, %v402_v40 }
 0x171   :  { %v409_v44 = vpack.c.bf16 %v404_v43, %v404_v43 }
 0x173   :  { %443 = vmatmul.mubr.bf16.vlgmr.msra.gmra.mrb[4].mxu0 %v409_v44  ;;  %484 = vmatmul.mubr.bf16.vlgmr.msra.gmra.mrb[4].mxu1 %v409_v44 }
 0x174   :  { %548 = vmatpush1.bf16.msra.mxu0 %v1957_v3  ;;  %589 = vmatpush1.bf16.msra.mxu1 %v1959_v4 }
 0x175   :  { %549 = vmatprep.subr.bf16.mxu0 %v1962_v5  ;;  %590 = vmatprep.subr.bf16.mxu1 %v1966_v6 }
 0x176   :  { %579 = vmatprep.mubr.bf16.mxu0 %v1854_v2  ;;  %620 = vmatprep.mubr.bf16.mxu1 %v1854_v2 }
 0x178   :  { %550 = vmatpush1.bf16.msra.mxu0 %v1968_v7  ;;  %591 = vmatpush1.bf16.msra.mxu1 %v1971_v8 }
 0x179   :  { %551 = vmatprep.subr.bf16.mxu0 %v1974_v9  ;;  %592 = vmatprep.subr.bf16.mxu1 %v1976_v10 }
 0x17c   :  { %552 = vmatpush1.bf16.msra.mxu0 %v1978_v11  ;;  %593 = vmatpush1.bf16.msra.mxu1 %v1980_v12 }
 0x17d   :  { %553 = vmatprep.subr.bf16.mxu0 %v1984_v13  ;;  %594 = vmatprep.subr.bf16.mxu1 %v1988_v14 }
 0x180   :  { %554 = vmatpush1.bf16.msra.mxu0 %v1990_v15  ;;  %595 = vmatpush1.bf16.msra.mxu1 %v1994_v16 }
 0x181   :  { %555 = vmatprep.subr.bf16.mxu0 %v1996_v17  ;;  %596 = vmatprep.subr.bf16.mxu1 %v2000_v18 }
 0x184   :  { %556 = vmatpush1.bf16.msra.mxu0 %v2002_v19  ;;  %597 = vmatpush1.bf16.msra.mxu1 %v2004_v20 }
 0x185   :  { %557 = vmatprep.subr.bf16.mxu0 %v2008_v21  ;;  %598 = vmatprep.subr.bf16.mxu1 %v2012_v22 }
 0x188   :  { %558 = vmatpush1.bf16.msra.mxu0 %v2016_v23  ;;  %599 = vmatpush1.bf16.msra.mxu1 %v2018_v24 }
 0x189   :  { %559 = vmatprep.subr.bf16.mxu0 %v2022_v25  ;;  %600 = vmatprep.subr.bf16.mxu1 %v2024_v26 }
 0x18c   :  { %560 = vmatpush1.bf16.msra.mxu0 %v2028_v27  ;;  %601 = vmatpush1.bf16.msra.mxu1 %v2030_v28 }
 0x18d   :  { %561 = vmatprep.subr.bf16.mxu0 %v2034_v29  ;;  %602 = vmatprep.subr.bf16.mxu1 %v2036_v30 }
 0x190   :  { %562 = vmatpush1.bf16.msra.mxu0 %v2040_v31  ;;  %603 = vmatpush1.bf16.msra.mxu1 %v2042_v32 }
 0x191   :  { %684 = vmatprep.subr.bf16.mxu0 %v1950_v0  ;;  %725 = vmatprep.subr.bf16.mxu1 %v1952_v1 }
 0x246   :  { %v444_v46 = vpop.f32.mrb[4].mxu0  ;;  %v485_v47 = vpop.f32.mrb[4].mxu1 }
 0x247   :  { %v446_v48 = vpop.f32.mrb[5].mxu0  ;;  %v487_v49 = vpop.f32.mrb[5].mxu1 }
 0x248   :  { %v496_v51 = vcombine.low %v444_v46, %v446_v48  ;;  %v497_v53 = vcombine.low %v485_v47, %v487_v49  ;;  %v448_v54 = vpop.f32.mrb[6].mxu0  ;;  %v489_v55 = vpop.f32.mrb[6].mxu1 }
 0x249   :  { %v449_v56 = vpop.f32.mrb[7].mxu0  ;;  %v490_v57 = vpop.f32.mrb[7].mxu1 }
 0x24a   :  { %v504_v58 = vrot.slane %v496_v51, %v2091_v42  ;;  %v511_v59 = vrot.slane %v497_v53, %v2091_v42 }
 0x24c   :  { %v512_v61 = vcombine.low %v504_v58, %v511_v59 }
 0x24e   :  { %v519_v62 = vrot.slane %v512_v61, %v2091_v42 }
 0x250   :  { %v521_v63 = vadd.f32 %v519_v62, %v408_v60 }
 0x252   :  { %v1507_v33 = vmul.f32 -1.442695, %v521_v63  ;;  %v529_v36 = vrot.slane %v521_v63, 3 }
 0x254   :  { %1666 = vpow2.f32 %v1507_v33 }
 0x25e   :  { %v1667_v34 = vpop.eup %1666 }
 0x25f   :  { %v525_v35 = vadd.f32 1.0, %v1667_v34 }
 0x261   :  { %1668 = vrcp.f32 %v525_v35 }
 0x262   :  { %1670 = vtanh.f32 %v529_v36 }
 0x26b   :  { %v1669_v40 = vpop.eup %1668 }
 0x26c   :  { %v533_v41 = vrot.slane %v1669_v40, 1  ;;  %v1671_v43 = vpop.eup %1670  ;;  %v539_v47 = vrot.slane %v1669_v40, 2 }
 0x26d   :  { %v536_v44 = vmul.f32 %v1671_v43, %v1669_v40 }
 0x26e   :  { %v535_v45 = vmul.f32 %v533_v41, %v2103_v39  ;;  %v543_v39 = vstv %s1508_s22 }
 0x26f   :  { %v544_v57 = vmul.f32 %v543_v39, %v2088_v38 }
 0x270   :  { %v2146_v46 = vadd.f32 %v536_v44, %v535_v45 }
 0x271   :  { %v545_v34 = vadd.f32 %v544_v57, %v2097_v50 }
 0x272   :  { %1672 = vtanh.f32 %v2146_v46 }
 0x27c   :  { %v1673_v48 = vpop.eup %1672 }
 0x27d   :  { %v541_v49 = vmul.f32 %v1673_v48, %v539_v47 }
 0x27f   :  { %v546_v51 = vpack.c.bf16 %v541_v49, %v541_v49 }
 0x281   :  { %580 = vmatmul.mubr.bf16.vlgmr.msra.gmra.mrb[8].mxu0 %v546_v51  ;;  %621 = vmatmul.mubr.bf16.vlgmr.msra.gmra.mrb[8].mxu1 %v546_v51 }
 0x282   :  { %685 = vmatpush1.bf16.msra.mxu0 %v1957_v3  ;;  %726 = vmatpush1.bf16.msra.mxu1 %v1959_v4 }
 0x283   :  { %686 = vmatprep.subr.bf16.mxu0 %v1962_v5  ;;  %727 = vmatprep.subr.bf16.mxu1 %v1966_v6 }
 0x284   :  { %716 = vmatprep.mubr.bf16.mxu0 %v1854_v2  ;;  %757 = vmatprep.mubr.bf16.mxu1 %v1854_v2 }
 0x286   :  { %687 = vmatpush1.bf16.msra.mxu0 %v1968_v7  ;;  %728 = vmatpush1.bf16.msra.mxu1 %v1971_v8 }
 0x287   :  { %688 = vmatprep.subr.bf16.mxu0 %v1974_v9  ;;  %729 = vmatprep.subr.bf16.mxu1 %v1976_v10 }
 0x28a   :  { %689 = vmatpush1.bf16.msra.mxu0 %v1978_v11  ;;  %730 = vmatpush1.bf16.msra.mxu1 %v1980_v12 }
 0x28b   :  { %690 = vmatprep.subr.bf16.mxu0 %v1984_v13  ;;  %731 = vmatprep.subr.bf16.mxu1 %v1988_v14 }
 0x28e   :  { %691 = vmatpush1.bf16.msra.mxu0 %v1990_v15  ;;  %732 = vmatpush1.bf16.msra.mxu1 %v1994_v16 }
 0x28f   :  { %692 = vmatprep.subr.bf16.mxu0 %v1996_v17  ;;  %733 = vmatprep.subr.bf16.mxu1 %v2000_v18 }
 0x292   :  { %693 = vmatpush1.bf16.msra.mxu0 %v2002_v19  ;;  %734 = vmatpush1.bf16.msra.mxu1 %v2004_v20 }
 0x293   :  { %694 = vmatprep.subr.bf16.mxu0 %v2008_v21  ;;  %735 = vmatprep.subr.bf16.mxu1 %v2012_v22 }
 0x296   :  { %695 = vmatpush1.bf16.msra.mxu0 %v2016_v23  ;;  %736 = vmatpush1.bf16.msra.mxu1 %v2018_v24 }
 0x297   :  { %696 = vmatprep.subr.bf16.mxu0 %v2022_v25  ;;  %737 = vmatprep.subr.bf16.mxu1 %v2024_v26 }
 0x29a   :  { %697 = vmatpush1.bf16.msra.mxu0 %v2028_v27  ;;  %738 = vmatpush1.bf16.msra.mxu1 %v2030_v28 }
 0x29b   :  { %698 = vmatprep.subr.bf16.mxu0 %v2034_v29  ;;  %739 = vmatprep.subr.bf16.mxu1 %v2036_v30 }
 0x29e   :  { %699 = vmatpush1.bf16.msra.mxu0 %v2040_v31  ;;  %740 = vmatpush1.bf16.msra.mxu1 %v2042_v32 }
 0x29f   :  { %821 = vmatprep.subr.bf16.mxu0 %v1950_v0  ;;  %862 = vmatprep.subr.bf16.mxu1 %v1952_v1 }
 0x354   :  { %v581_v52 = vpop.f32.mrb[8].mxu0  ;;  %v622_v53 = vpop.f32.mrb[8].mxu1 }
 0x355   :  { %v583_v54 = vpop.f32.mrb[9].mxu0  ;;  %v624_v55 = vpop.f32.mrb[9].mxu1 }
 0x356   :  { %v633_v56 = vcombine.low %v581_v52, %v583_v54  ;;  %v634_v58 = vcombine.low %v622_v53, %v624_v55  ;;  %v585_v59 = vpop.f32.mrb[10].mxu0  ;;  %v626_v60 = vpop.f32.mrb[10].mxu1 }
 0x357   :  { %v586_v61 = vpop.f32.mrb[11].mxu0  ;;  %v627_v62 = vpop.f32.mrb[11].mxu1 }
 0x358   :  { %v641_v63 = vrot.slane %v633_v56, %v2091_v42  ;;  %v648_v33 = vrot.slane %v634_v58, %v2091_v42 }
 0x35a   :  { %v649_v35 = vcombine.low %v641_v63, %v648_v33 }
 0x35c   :  { %v656_v36 = vrot.slane %v649_v35, %v2091_v42 }
 0x35e   :  { %v658_v40 = vadd.f32 %v656_v36, %v545_v34 }
 0x360   :  { %v1509_v41 = vmul.f32 -1.442695, %v658_v40  ;;  %v666_v45 = vrot.slane %v658_v40, 3 }
 0x362   :  { %1674 = vpow2.f32 %v1509_v41 }
 0x36c   :  { %v1675_v43 = vpop.eup %1674 }
 0x36d   :  { %v662_v44 = vadd.f32 1.0, %v1675_v43 }
 0x36f   :  { %1676 = vrcp.f32 %v662_v44 }
 0x370   :  { %1678 = vtanh.f32 %v666_v45 }
 0x379   :  { %v1677_v47 = vpop.eup %1676 }
 0x37a   :  { %v670_v48 = vrot.slane %v1677_v47, 1  ;;  %v1679_v49 = vpop.eup %1678  ;;  %v676_v53 = vrot.slane %v1677_v47, 2 }
 0x37b   :  { %v673_v51 = vmul.f32 %v1679_v49, %v1677_v47 }
 0x37c   :  { %v672_v39 = vmul.f32 %v670_v48, %v2146_v46  ;;  %v680_v46 = vstv %s1510_s23 }
 0x37d   :  { %v681_v62 = vmul.f32 %v680_v46, %v2088_v38 }
 0x37e   :  { %v2189_v52 = vadd.f32 %v673_v51, %v672_v39 }
 0x37f   :  { %v682_v43 = vadd.f32 %v681_v62, %v2097_v50 }
 0x380   :  { %1680 = vtanh.f32 %v2189_v52 }
 0x38a   :  { %v1681_v54 = vpop.eup %1680 }
 0x38b   :  { %v678_v55 = vmul.f32 %v1681_v54, %v676_v53 }
 0x38d   :  { %v683_v56 = vpack.c.bf16 %v678_v55, %v678_v55 }
 0x38f   :  { %717 = vmatmul.mubr.bf16.vlgmr.msra.gmra.mrb[12].mxu0 %v683_v56  ;;  %758 = vmatmul.mubr.bf16.vlgmr.msra.gmra.mrb[12].mxu1 %v683_v56 }
 0x390   :  { %822 = vmatpush1.bf16.msra.mxu0 %v1957_v3  ;;  %863 = vmatpush1.bf16.msra.mxu1 %v1959_v4 }
 0x391   :  { %823 = vmatprep.subr.bf16.mxu0 %v1962_v5  ;;  %864 = vmatprep.subr.bf16.mxu1 %v1966_v6 }
 0x392   :  { %853 = vmatprep.mubr.bf16.mxu0 %v1854_v2  ;;  %894 = vmatprep.mubr.bf16.mxu1 %v1854_v2 }
 0x394   :  { %824 = vmatpush1.bf16.msra.mxu0 %v1968_v7  ;;  %865 = vmatpush1.bf16.msra.mxu1 %v1971_v8 }
 0x395   :  { %825 = vmatprep.subr.bf16.mxu0 %v1974_v9  ;;  %866 = vmatprep.subr.bf16.mxu1 %v1976_v10 }
 0x398   :  { %826 = vmatpush1.bf16.msra.mxu0 %v1978_v11  ;;  %867 = vmatpush1.bf16.msra.mxu1 %v1980_v12 }
 0x399   :  { %827 = vmatprep.subr.bf16.mxu0 %v1984_v13  ;;  %868 = vmatprep.subr.bf16.mxu1 %v1988_v14 }
 0x39c   :  { %828 = vmatpush1.bf16.msra.mxu0 %v1990_v15  ;;  %869 = vmatpush1.bf16.msra.mxu1 %v1994_v16 }
 0x39d   :  { %829 = vmatprep.subr.bf16.mxu0 %v1996_v17  ;;  %870 = vmatprep.subr.bf16.mxu1 %v2000_v18 }
 0x3a0   :  { %830 = vmatpush1.bf16.msra.mxu0 %v2002_v19  ;;  %871 = vmatpush1.bf16.msra.mxu1 %v2004_v20 }
 0x3a1   :  { %831 = vmatprep.subr.bf16.mxu0 %v2008_v21  ;;  %872 = vmatprep.subr.bf16.mxu1 %v2012_v22 }
 0x3a4   :  { %832 = vmatpush1.bf16.msra.mxu0 %v2016_v23  ;;  %873 = vmatpush1.bf16.msra.mxu1 %v2018_v24 }
 0x3a5   :  { %833 = vmatprep.subr.bf16.mxu0 %v2022_v25  ;;  %874 = vmatprep.subr.bf16.mxu1 %v2024_v26 }
 0x3a8   :  { %834 = vmatpush1.bf16.msra.mxu0 %v2028_v27  ;;  %875 = vmatpush1.bf16.msra.mxu1 %v2030_v28 }
 0x3a9   :  { %835 = vmatprep.subr.bf16.mxu0 %v2034_v29  ;;  %876 = vmatprep.subr.bf16.mxu1 %v2036_v30 }
 0x3ac   :  { %836 = vmatpush1.bf16.msra.mxu0 %v2040_v31  ;;  %877 = vmatpush1.bf16.msra.mxu1 %v2042_v32 }
 0x3ad   :  { %958 = vmatprep.subr.bf16.mxu0 %v1950_v0  ;;  %999 = vmatprep.subr.bf16.mxu1 %v1952_v1 }
 0x462   :  { %v718_v57 = vpop.f32.mrb[12].mxu0  ;;  %v759_v58 = vpop.f32.mrb[12].mxu1 }
 0x463   :  { %v720_v59 = vpop.f32.mrb[13].mxu0  ;;  %v761_v60 = vpop.f32.mrb[13].mxu1 }
 0x464   :  { %v770_v61 = vcombine.low %v718_v57, %v720_v59  ;;  %v771_v63 = vcombine.low %v759_v58, %v761_v60  ;;  %v722_v33 = vpop.f32.mrb[14].mxu0  ;;  %v763_v34 = vpop.f32.mrb[14].mxu1 }
 0x465   :  { %v723_v35 = vpop.f32.mrb[15].mxu0  ;;  %v764_v36 = vpop.f32.mrb[15].mxu1 }
 0x466   :  { %v778_v40 = vrot.slane %v770_v61, %v2091_v42  ;;  %v785_v41 = vrot.slane %v771_v63, %v2091_v42 }
 0x468   :  { %v786_v44 = vcombine.low %v778_v40, %v785_v41 }
 0x46a   :  { %v793_v45 = vrot.slane %v786_v44, %v2091_v42 }
 0x46c   :  { %v795_v47 = vadd.f32 %v793_v45, %v682_v43 }
 0x46e   :  { %v1511_v48 = vmul.f32 -1.442695, %v795_v47  ;;  %v803_v39 = vrot.slane %v795_v47, 3 }
 0x470   :  { %1682 = vpow2.f32 %v1511_v48 }
 0x47a   :  { %v1683_v49 = vpop.eup %1682 }
 0x47b   :  { %v799_v51 = vadd.f32 1.0, %v1683_v49 }
 0x47d   :  { %1684 = vrcp.f32 %v799_v51 }
 0x47e   :  { %1686 = vtanh.f32 %v803_v39 }
 0x487   :  { %v1685_v53 = vpop.eup %1684 }
 0x488   :  { %v807_v54 = vrot.slane %v1685_v53, 1  ;;  %v1687_v55 = vpop.eup %1686  ;;  %v813_v58 = vrot.slane %v1685_v53, 2 }
 0x489   :  { %v810_v56 = vmul.f32 %v1687_v55, %v1685_v53 }
 0x48a   :  { %v809_v46 = vmul.f32 %v807_v54, %v2189_v52  ;;  %v817_v52 = vstv %s1512_s24 }
 0x48b   :  { %v818_v36 = vmul.f32 %v817_v52, %v2088_v38 }
 0x48c   :  { %v2232_v57 = vadd.f32 %v810_v56, %v809_v46 }
 0x48d   :  { %v819_v49 = vadd.f32 %v818_v36, %v2097_v50 }
 0x48e   :  { %1688 = vtanh.f32 %v2232_v57 }
 0x498   :  { %v1689_v59 = vpop.eup %1688 }
 0x499   :  { %v815_v60 = vmul.f32 %v1689_v59, %v813_v58 }
 0x49b   :  { %v820_v61 = vpack.c.bf16 %v815_v60, %v815_v60 }
 0x49d   :  { %854 = vmatmul.mubr.bf16.vlgmr.msra.gmra.mrb[16].mxu0 %v820_v61  ;;  %895 = vmatmul.mubr.bf16.vlgmr.msra.gmra.mrb[16].mxu1 %v820_v61 }
 0x49e   :  { %959 = vmatpush1.bf16.msra.mxu0 %v1957_v3  ;;  %1000 = vmatpush1.bf16.msra.mxu1 %v1959_v4 }
 0x49f   :  { %960 = vmatprep.subr.bf16.mxu0 %v1962_v5  ;;  %1001 = vmatprep.subr.bf16.mxu1 %v1966_v6 }
 0x4a0   :  { %990 = vmatprep.mubr.bf16.mxu0 %v1854_v2  ;;  %1031 = vmatprep.mubr.bf16.mxu1 %v1854_v2 }
 0x4a2   :  { %961 = vmatpush1.bf16.msra.mxu0 %v1968_v7  ;;  %1002 = vmatpush1.bf16.msra.mxu1 %v1971_v8 }
 0x4a3   :  { %962 = vmatprep.subr.bf16.mxu0 %v1974_v9  ;;  %1003 = vmatprep.subr.bf16.mxu1 %v1976_v10 }
 0x4a6   :  { %963 = vmatpush1.bf16.msra.mxu0 %v1978_v11  ;;  %1004 = vmatpush1.bf16.msra.mxu1 %v1980_v12 }
 0x4a7   :  { %964 = vmatprep.subr.bf16.mxu0 %v1984_v13  ;;  %1005 = vmatprep.subr.bf16.mxu1 %v1988_v14 }
 0x4aa   :  { %965 = vmatpush1.bf16.msra.mxu0 %v1990_v15  ;;  %1006 = vmatpush1.bf16.msra.mxu1 %v1994_v16 }
 0x4ab   :  { %966 = vmatprep.subr.bf16.mxu0 %v1996_v17  ;;  %1007 = vmatprep.subr.bf16.mxu1 %v2000_v18 }
 0x4ae   :  { %967 = vmatpush1.bf16.msra.mxu0 %v2002_v19  ;;  %1008 = vmatpush1.bf16.msra.mxu1 %v2004_v20 }
 0x4af   :  { %968 = vmatprep.subr.bf16.mxu0 %v2008_v21  ;;  %1009 = vmatprep.subr.bf16.mxu1 %v2012_v22 }
 0x4b2   :  { %969 = vmatpush1.bf16.msra.mxu0 %v2016_v23  ;;  %1010 = vmatpush1.bf16.msra.mxu1 %v2018_v24 }
 0x4b3   :  { %970 = vmatprep.subr.bf16.mxu0 %v2022_v25  ;;  %1011 = vmatprep.subr.bf16.mxu1 %v2024_v26 }
 0x4b6   :  { %971 = vmatpush1.bf16.msra.mxu0 %v2028_v27  ;;  %1012 = vmatpush1.bf16.msra.mxu1 %v2030_v28 }
 0x4b7   :  { %972 = vmatprep.subr.bf16.mxu0 %v2034_v29  ;;  %1013 = vmatprep.subr.bf16.mxu1 %v2036_v30 }
 0x4ba   :  { %973 = vmatpush1.bf16.msra.mxu0 %v2040_v31  ;;  %1014 = vmatpush1.bf16.msra.mxu1 %v2042_v32 }
 0x4bb   :  { %1095 = vmatprep.subr.bf16.mxu0 %v1950_v0  ;;  %1136 = vmatprep.subr.bf16.mxu1 %v1952_v1 }
 0x570   :  { %v855_v62 = vpop.f32.mrb[16].mxu0  ;;  %v896_v63 = vpop.f32.mrb[16].mxu1 }
 0x571   :  { %v857_v33 = vpop.f32.mrb[17].mxu0  ;;  %v898_v34 = vpop.f32.mrb[17].mxu1 }
 0x572   :  { %v907_v35 = vcombine.low %v855_v62, %v857_v33  ;;  %v908_v40 = vcombine.low %v896_v63, %v898_v34  ;;  %v859_v41 = vpop.f32.mrb[18].mxu0  ;;  %v900_v43 = vpop.f32.mrb[18].mxu1 }
 0x573   :  { %v860_v44 = vpop.f32.mrb[19].mxu0  ;;  %v901_v45 = vpop.f32.mrb[19].mxu1 }
 0x574   :  { %v915_v47 = vrot.slane %v907_v35, %v2091_v42  ;;  %v922_v48 = vrot.slane %v908_v40, %v2091_v42 }
 0x576   :  { %v923_v51 = vcombine.low %v915_v47, %v922_v48 }
 0x578   :  { %v930_v39 = vrot.slane %v923_v51, %v2091_v42 }
 0x57a   :  { %v932_v53 = vadd.f32 %v930_v39, %v819_v49 }
 0x57c   :  { %v1513_v54 = vmul.f32 -1.442695, %v932_v53  ;;  %v940_v46 = vrot.slane %v932_v53, 3 }
 0x57e   :  { %1690 = vpow2.f32 %v1513_v54 }
 0x588   :  { %v1691_v55 = vpop.eup %1690 }
 0x589   :  { %v936_v56 = vadd.f32 1.0, %v1691_v55  ;;  %v1722_v55 = vld [vmem:[#allocation7] ss:$16 sps:$4 sm:$0xff]  }
 0x58b   :  { %1692 = vrcp.f32 %v936_v56  ;;  %v1723_v56 = vld [vmem:[#allocation7 + $0x8] ss:$16 sps:$4 sm:$0xff]  }
 0x58c   :  { %1694 = vtanh.f32 %v940_v46  ;;  %v1724_v46 = vld [vmem:[#allocation7 + $0x24] ss:$16 sps:$4 sm:$0xff]  }
 0x595   :  { %v1693_v58 = vpop.eup %1692 }
 0x596   :  { %v944_v59 = vrot.slane %v1693_v58, 1  ;;  %v1695_v60 = vpop.eup %1694  ;;  %v950_v63 = vrot.slane %v1693_v58, 2 }
 0x597   :  { %v947_v61 = vmul.f32 %v1695_v60, %v1693_v58  ;;  %v1725_v58 = vld [vmem:[#allocation7 + $0x2c] ss:$16 sps:$4 sm:$0xff]   ;;  %v1727_v60 = vld [vmem:[#allocation7 + $0x28] ss:$16 sps:$4 sm:$0xff]  }
 0x598   :  { %v946_v52 = vmul.f32 %v944_v59, %v2232_v57  ;;  %v1726_v59 = vld [vmem:[#allocation7 + $0x20] ss:$16 sps:$4 sm:$0xff]  }
 0x59a   :  { %v2275_v62 = vadd.f32 %v947_v61, %v946_v52  ;;  %v1728_v61 = vld [vmem:[#allocation7 + $0x44] ss:$16 sps:$4 sm:$0xff]   ;;  %v1729_v52 = vld [vmem:[#allocation7 + $0x4c] ss:$16 sps:$4 sm:$0xff]  }
 0x59c   :  { %1696 = vtanh.f32 %v2275_v62 }
 0x5a6   :  { %v1697_v33 = vpop.eup %1696 }
 0x5a7   :  { %v952_v34 = vmul.f32 %v1697_v33, %v950_v63  ;;  %v1731_v63 = vld [vmem:[#allocation7 + $0x48] ss:$16 sps:$4 sm:$0xff]   ;;  %v1732_v33 = vld [vmem:[#allocation7 + $0x64] ss:$16 sps:$4 sm:$0xff]  }
 0x5a9   :  { %v957_v35 = vpack.c.bf16 %v952_v34, %v952_v34  ;;  %v1733_v34 = vld [vmem:[#allocation7 + $0x6c] ss:$16 sps:$4 sm:$0xff]  }
 0x5ab   :  { %991 = vmatmul.mubr.bf16.vlgmr.msra.gmra.mrb[20].mxu0 %v957_v35  ;;  %1032 = vmatmul.mubr.bf16.vlgmr.msra.gmra.mrb[20].mxu1 %v957_v35  ;;  %v1734_v35 = vld [vmem:[#allocation7 + $0x60] ss:$16 sps:$4 sm:$0xff]  }
 0x5ac   :  { %1096 = vmatpush1.bf16.msra.mxu0 %v1957_v3  ;;  %1137 = vmatpush1.bf16.msra.mxu1 %v1959_v4  ;;  %v954_v3 = vstv %s1514_s25 }
 0x5ad   :  { %1097 = vmatprep.subr.bf16.mxu0 %v1962_v5  ;;  %1138 = vmatprep.subr.bf16.mxu1 %v1966_v6 }
 0x5ae   :  { %1127 = vmatprep.mubr.bf16.mxu0 %v1854_v2  ;;  %1168 = vmatprep.mubr.bf16.mxu1 %v1854_v2 }
 0x5b0   :  { %1098 = vmatpush1.bf16.msra.mxu0 %v1968_v7  ;;  %1139 = vmatpush1.bf16.msra.mxu1 %v1971_v8 }
 0x5b1   :  { %1099 = vmatprep.subr.bf16.mxu0 %v1974_v9  ;;  %1140 = vmatprep.subr.bf16.mxu1 %v1976_v10  ;;  %v955_v9 = vmul.f32 %v954_v3, %v2088_v38  ;;  %v1735_v3 = vld [vmem:[#allocation7 + $0x68] ss:$16 sps:$4 sm:$0xff]  }
 0x5b4   :  { %1100 = vmatpush1.bf16.msra.mxu0 %v1978_v11  ;;  %1141 = vmatpush1.bf16.msra.mxu1 %v1980_v12 }
 0x5b5   :  { %1101 = vmatprep.subr.bf16.mxu0 %v1984_v13  ;;  %1142 = vmatprep.subr.bf16.mxu1 %v1988_v14 }
 0x5b8   :  { %1102 = vmatpush1.bf16.msra.mxu0 %v1990_v15  ;;  %1143 = vmatpush1.bf16.msra.mxu1 %v1994_v16 }
 0x5b9   :  { %1103 = vmatprep.subr.bf16.mxu0 %v1996_v17  ;;  %1144 = vmatprep.subr.bf16.mxu1 %v2000_v18 }
 0x5bc   :  { %1104 = vmatpush1.bf16.msra.mxu0 %v2002_v19  ;;  %1145 = vmatpush1.bf16.msra.mxu1 %v2004_v20 }
 0x5bd   :  { %1105 = vmatprep.subr.bf16.mxu0 %v2008_v21  ;;  %1146 = vmatprep.subr.bf16.mxu1 %v2012_v22 }
 0x5c0   :  { %1106 = vmatpush1.bf16.msra.mxu0 %v2016_v23  ;;  %1147 = vmatpush1.bf16.msra.mxu1 %v2018_v24 }
 0x5c1   :  { %1107 = vmatprep.subr.bf16.mxu0 %v2022_v25  ;;  %1148 = vmatprep.subr.bf16.mxu1 %v2024_v26 }
 0x5c4   :  { %1108 = vmatpush1.bf16.msra.mxu0 %v2028_v27  ;;  %1149 = vmatpush1.bf16.msra.mxu1 %v2030_v28 }
 0x5c5   :  { %1109 = vmatprep.subr.bf16.mxu0 %v2034_v29  ;;  %1150 = vmatprep.subr.bf16.mxu1 %v2036_v30 }
 0x5c8   :  { %1110 = vmatpush1.bf16.msra.mxu0 %v2040_v31  ;;  %1151 = vmatpush1.bf16.msra.mxu1 %v2042_v32 }
 0x5c9   :  { %1232 = vmatprep.subr.bf16.mxu0 %v1950_v0  ;;  %1273 = vmatprep.subr.bf16.mxu1 %v1952_v1  ;;  %v956_v1 = vadd.f32 %v955_v9, %v2097_v50 }
 0x67e   :  { %v992_v4 = vpop.f32.mrb[20].mxu0  ;;  %v1033_v5 = vpop.f32.mrb[20].mxu1 }
 0x67f   :  { %v994_v6 = vpop.f32.mrb[21].mxu0  ;;  %v1035_v7 = vpop.f32.mrb[21].mxu1 }
 0x680   :  { %v1044_v8 = vcombine.low %v992_v4, %v994_v6  ;;  %v1045_v10 = vcombine.low %v1033_v5, %v1035_v7  ;;  %v996_v11 = vpop.f32.mrb[22].mxu0  ;;  %v1037_v12 = vpop.f32.mrb[22].mxu1  ;;  %v1737_v4 = vld [vmem:[#allocation7 + $0x8c] ss:$16 sps:$4 sm:$0xff]  }
 0x681   :  { %v997_v13 = vpop.f32.mrb[23].mxu0  ;;  %v1038_v14 = vpop.f32.mrb[23].mxu1 }
 0x682   :  { %v1052_v15 = vrot.slane %v1044_v8, %v2091_v42  ;;  %v1059_v0 = vrot.slane %v1045_v10, %v2091_v42 }
 0x684   :  { %v1060_v16 = vcombine.low %v1052_v15, %v1059_v0 }
 0x686   :  { %v1067_v17 = vrot.slane %v1060_v16, %v2091_v42 }
 0x688   :  { %v1069_v18 = vadd.f32 %v1067_v17, %v956_v1 }
 0x68a   :  { %v1515_v57 = vmul.f32 -1.442695, %v1069_v18  ;;  %v1077_v41 = vrot.slane %v1069_v18, 3 }
 0x68c   :  { %1698 = vpow2.f32 %v1515_v57  ;;  %v1364_v57 = vld [vmem:[#allocation9] sm:$0xff] }
 0x696   :  { %v1699_v36 = vpop.eup %1698 }
 0x697   :  { %v1073_v40 = vadd.f32 1.0, %v1699_v36  ;;  %v1365_v36 = vld [vmem:[#allocation9 + $0x8] sm:$0xff] }
 0x699   :  { %1700 = vrcp.f32 %v1073_v40  ;;  %v1573_v40 = vpack.c.bf16 %v1365_v36, %v1364_v57 }
 0x69a   :  { %1702 = vtanh.f32 %v1077_v41  ;;  %v1856_v41 = vmov 0.0|0.0  }
 0x6a3   :  { %v1701_v43 = vpop.eup %1700 }
 0x6a4   :  { %v1081_v44 = vrot.slane %v1701_v43, 1  ;;  %v1703_v45 = vpop.eup %1702  ;;  %v1087_v51 = vrot.slane %v1701_v43, 2 }
 0x6a5   :  { %v1084_v47 = vmul.f32 %v1703_v45, %v1701_v43  ;;  %v1366_v43 = vld [vmem:[#allocation9 + $0x10] sm:$0xff] }
 0x6a6   :  { %v1083_v48 = vmul.f32 %v1081_v44, %v2275_v62  ;;  %v1730_v62 = vld [vmem:[#allocation7 + $0x40] ss:$16 sps:$4 sm:$0xff]   ;;  %v1367_v44 = vld [vmem:[#allocation9 + $0x18] sm:$0xff] }
 0x6a7   :  { %v1576_v45 = vpack.c.bf16 %v1367_v44, %v1366_v43 }
 0x6a8   :  { %v2318_v49 = vadd.f32 %v1084_v47, %v1083_v48  ;;  %v1368_v47 = vld [vmem:[#allocation9 + $0x20] sm:$0xff]  ;;  %v1369_v48 = vld [vmem:[#allocation9 + $0x28] sm:$0xff] }
 0x6aa   :  { %1704 = vtanh.f32 %v2318_v49 }
 0x6b4   :  { %v1705_v39 = vpop.eup %1704 }
 0x6b5   :  { %v1089_v53 = vmul.f32 %v1705_v39, %v1087_v51  ;;  %v1579_v51 = vpack.c.bf16 %v1369_v48, %v1368_v47  ;;  %v1370_v39 = vld [vmem:[#allocation9 + $0x30] sm:$0xff] }
 0x6b7   :  { %v1094_v54 = vpack.c.bf16 %v1089_v53, %v1089_v53  ;;  %v1371_v53 = vld [vmem:[#allocation9 + $0x38] sm:$0xff] }
 0x6b9   :  { %1128 = vmatmul.mubr.bf16.vlgmr.msra.gmra.mrb[24].mxu0 %v1094_v54  ;;  %1169 = vmatmul.mubr.bf16.vlgmr.msra.gmra.mrb[24].mxu1 %v1094_v54  ;;  %v1582_v54 = vpack.c.bf16 %v1371_v53, %v1370_v39 }
 0x6ba   :  { %1233 = vmatpush1.bf16.msra.mxu0 %v1722_v55  ;;  %1274 = vmatpush1.bf16.msra.mxu1 %v1723_v56  ;;  %v1372_v55 = vld [vmem:[#allocation9 + $0x40] sm:$0xff]  ;;  %v1373_v56 = vld [vmem:[#allocation9 + $0x48] sm:$0xff] }
 0x6bb   :  { %1234 = vmatprep.subr.bf16.mxu0 %v1724_v46  ;;  %1275 = vmatprep.subr.bf16.mxu1 %v1725_v58  ;;  %v1585_v46 = vpack.c.bf16 %v1373_v56, %v1372_v55  ;;  %v1374_v58 = vld [vmem:[#allocation9 + $0x50] sm:$0xff] }
 0x6bc   :  { %1264 = vmatprep.mubr.bf16.mxu0 %v1854_v2  ;;  %1305 = vmatprep.mubr.bf16.mxu1 %v1854_v2  ;;  %v1736_v2 = vld [vmem:[#allocation7 + $0x84] ss:$16 sps:$4 sm:$0xff]  }
 0x6be   :  { %1235 = vmatpush1.bf16.msra.mxu0 %v1726_v59  ;;  %1276 = vmatpush1.bf16.msra.mxu1 %v1727_v60  ;;  %v1375_v59 = vld [vmem:[#allocation9 + $0x58] sm:$0xff] }
 0x6bf   :  { %1236 = vmatprep.subr.bf16.mxu0 %v1728_v61  ;;  %1277 = vmatprep.subr.bf16.mxu1 %v1729_v52  ;;  %v1588_v60 = vpack.c.bf16 %v1375_v59, %v1374_v58  ;;  %v1376_v61 = vld [vmem:[#allocation9 + $0x60] sm:$0xff]  ;;  %v1377_v52 = vld [vmem:[#allocation9 + $0x68] sm:$0xff] }
 0x6c2   :  { %1237 = vmatpush1.bf16.msra.mxu0 %v1730_v62  ;;  %1278 = vmatpush1.bf16.msra.mxu1 %v1731_v63  ;;  %v1591_v62 = vpack.c.bf16 %v1377_v52, %v1376_v61  ;;  %v1378_v63 = vld [vmem:[#allocation9 + $0x70] sm:$0xff] }
 0x6c3   :  { %1238 = vmatprep.subr.bf16.mxu0 %v1732_v33  ;;  %1279 = vmatprep.subr.bf16.mxu1 %v1733_v34  ;;  %v1379_v33 = vld [vmem:[#allocation9 + $0x78] sm:$0xff] }
 0x6c4   :  { %v1594_v34 = vpack.c.bf16 %v1379_v33, %v1378_v63 }
 0x6c6   :  { %1239 = vmatpush1.bf16.msra.mxu0 %v1734_v35  ;;  %1280 = vmatpush1.bf16.msra.mxu1 %v1735_v3  ;;  %v1228_v35 = vstv %s1518_s27 }
 0x6c7   :  { %1240 = vmatprep.subr.bf16.mxu0 %v1736_v2  ;;  %1281 = vmatprep.subr.bf16.mxu1 %v1737_v4 }
 0x6ca   :  { %1241 = vmatpush1.bf16.msra.mxu0 %v2002_v19  ;;  %1282 = vmatpush1.bf16.msra.mxu1 %v2004_v20  ;;  %v1091_v19 = vstv %s1516_s26 }
 0x6cb   :  { %1242 = vmatprep.subr.bf16.mxu0 %v2008_v21  ;;  %1283 = vmatprep.subr.bf16.mxu1 %v2012_v22 }
 0x6ce   :  { %1243 = vmatpush1.bf16.msra.mxu0 %v2016_v23  ;;  %1284 = vmatpush1.bf16.msra.mxu1 %v2018_v24 }
 0x6cf   :  { %1244 = vmatprep.subr.bf16.mxu0 %v2022_v25  ;;  %1285 = vmatprep.subr.bf16.mxu1 %v2024_v26  ;;  %v1092_v25 = vmul.f32 %v1091_v19, %v2088_v38 }
 0x6d2   :  { %1245 = vmatpush1.bf16.msra.mxu0 %v2028_v27  ;;  %1286 = vmatpush1.bf16.msra.mxu1 %v2030_v28 }
 0x6d3   :  { %1246 = vmatprep.subr.bf16.mxu0 %v2034_v29  ;;  %1287 = vmatprep.subr.bf16.mxu1 %v2036_v30 }
 0x6d6   :  { %1247 = vmatpush1.bf16.msra.mxu0 %v2040_v31  ;;  %1288 = vmatpush1.bf16.msra.mxu1 %v2042_v32  ;;  %v1093_v32 = vadd.f32 %v1092_v25, %v2097_v50 }
 0x6d7   :  { %1572 = vmatprep.subr.bf16.mxu0 %v1856_v41 }
 0x78c   :  { %v1129_v20 = vpop.f32.mrb[24].mxu0  ;;  %v1170_v21 = vpop.f32.mrb[24].mxu1 }
 0x78d   :  { %v1131_v22 = vpop.f32.mrb[25].mxu0  ;;  %v1172_v23 = vpop.f32.mrb[25].mxu1 }
 0x78e   :  { %v1181_v24 = vcombine.low %v1129_v20, %v1131_v22  ;;  %v1182_v26 = vcombine.low %v1170_v21, %v1172_v23  ;;  %v1133_v27 = vpop.f32.mrb[26].mxu0  ;;  %v1174_v28 = vpop.f32.mrb[26].mxu1  ;;  %v1738_v21 = vld [vmem:[#allocation6] sm:$0xf] }
 0x78f   :  { %v1134_v5 = vpop.f32.mrb[27].mxu0  ;;  %v1175_v29 = vpop.f32.mrb[27].mxu1  ;;  %v1229_v22 = vmul.f32 %v1738_v21, %v1228_v35 }
 0x790   :  { %v1189_v30 = vrot.slane %v1181_v24, %v2091_v42  ;;  %v1196_v31 = vrot.slane %v1182_v26, %v2091_v42  ;;  %v1739_v29 = vld [vmem:[%s2372_s3] sm:$0xf] }
 0x792   :  { %v1197_v6 = vcombine.low %v1189_v30, %v1196_v31  ;;  %v1230_v30 = vadd.f32 %v1739_v29, %v1229_v22 }
 0x794   :  { %v1204_v7 = vrot.slane %v1197_v6, %v2091_v42 }
 0x796   :  { %v1206_v8 = vadd.f32 %v1204_v7, %v1093_v32 }
 0x798   :  { %v1517_v9 = vmul.f32 -1.442695, %v1206_v8  ;;  %v1214_v38 = vrot.slane %v1206_v8, 3 }
 0x79a   :  { %1706 = vpow2.f32 %v1517_v9 }
 0x7a4   :  { %v1707_v10 = vpop.eup %1706 }
 0x7a5   :  { %v1210_v11 = vadd.f32 1.0, %v1707_v10 }
 0x7a7   :  { %1708 = vrcp.f32 %v1210_v11 }
 0x7a8   :  { %1710 = vtanh.f32 %v1214_v38 }
 0x7b1   :  { %v1709_v12 = vpop.eup %1708 }
 0x7b2   :  { %v1218_v13 = vrot.slane %v1709_v12, 1  ;;  %v1711_v14 = vpop.eup %1710  ;;  %v1224_v50 = vrot.slane %v1709_v12, 2 }
 0x7b3   :  { %v1221_v15 = vmul.f32 %v1711_v14, %v1709_v12 }
 0x7b4   :  { %v1220_v0 = vmul.f32 %v1218_v13, %v2318_v49  ;;  %v1858_v49 = vmov 0.0  }
 0x7b6   :  { %v2343_v1 = vadd.f32 %v1221_v15, %v1220_v0 }
 0x7b8   :  { %1712 = vtanh.f32 %v2343_v1 }
 0x7c2   :  { %v1713_v16 = vpop.eup %1712 }
 0x7c3   :  { %v1226_v17 = vmul.f32 %v1713_v16, %v1224_v50 }
 0x7c5   :  { %v1231_v18 = vpack.c.bf16 %v1226_v17, %v1226_v17  ;;  %v1453_v17 = vsub.s32 0, %v2086_v37 }
 0x7c7   :  { %1265 = vmatmul.mubr.bf16.vlgmr.msra.gmra.mrb[28].mxu0 %v1231_v18  ;;  %1306 = vmatmul.mubr.bf16.vlgmr.msra.gmra.mrb[28].mxu1 %v1231_v18 }
 0x7c8   :  { %1574 = vmatpush3.bf16.msra.mxu0 %v1573_v40  ;;  %1569 = vmatprep.mubr.msk.f32.mxu0 %vm1857_vm0, %v1858_v49 }
 0x7c9   :  { %1575 = vmatprep.subr.bf16.mxu0 %v1856_v41 }
 0x7cc   :  { %1577 = vmatpush3.bf16.msra.mxu0 %v1576_v45 }
 0x7cd   :  { %1578 = vmatprep.subr.bf16.mxu0 %v1856_v41 }
 0x7d0   :  { %1580 = vmatpush3.bf16.msra.mxu0 %v1579_v51 }
 0x7d1   :  { %1581 = vmatprep.subr.bf16.mxu0 %v1856_v41 }
 0x7d4   :  { %1583 = vmatpush3.bf16.msra.mxu0 %v1582_v54 }
 0x7d5   :  { %1584 = vmatprep.subr.bf16.mxu0 %v1856_v41 }
 0x7d8   :  { %1586 = vmatpush3.bf16.msra.mxu0 %v1585_v46 }
 0x7d9   :  { %1587 = vmatprep.subr.bf16.mxu0 %v1856_v41 }
 0x7dc   :  { %1589 = vmatpush3.bf16.msra.mxu0 %v1588_v60 }
 0x7dd   :  { %1590 = vmatprep.subr.bf16.mxu0 %v1856_v41 }
 0x7e0   :  { %1592 = vmatpush3.bf16.msra.mxu0 %v1591_v62 }
 0x7e1   :  { %1593 = vmatprep.subr.bf16.mxu0 %v1856_v41 }
 0x7e4   :  { %1595 = vmatpush3.bf16.msra.mxu0 %v1594_v34 }
 0x89a   :  { %v1266_v3 = vpop.f32.mrb[28].mxu0  ;;  %v1307_v2 = vpop.f32.mrb[28].mxu1 }
 0x89b   :  { %v1268_v4 = vpop.f32.mrb[29].mxu0  ;;  %v1309_v19 = vpop.f32.mrb[29].mxu1 }
 0x89c   :  { %v1318_v20 = vcombine.low %v1266_v3, %v1268_v4  ;;  %v1319_v23 = vcombine.low %v1307_v2, %v1309_v19  ;;  %v1270_v24 = vpop.f32.mrb[30].mxu0  ;;  %v1311_v25 = vpop.f32.mrb[30].mxu1 }
 0x89d   :  { %v1271_v26 = vpop.f32.mrb[31].mxu0  ;;  %v1312_v27 = vpop.f32.mrb[31].mxu1 }
 0x89e   :  { %v1326_v28 = vrot.slane %v1318_v20, %v2091_v42  ;;  %v1333_v5 = vrot.slane %v1319_v23, %v2091_v42 }
 0x8a0   :  { %v1334_v31 = vcombine.low %v1326_v28, %v1333_v5 }
 0x8a2   :  { %v1341_v32 = vrot.slane %v1334_v31, %v2091_v42  ;;  %v1380_v42 = vld [vmem:[%s2374_s5] sm:$0x1] }
 0x8a4   :  { %v1343_v6 = vadd.f32 %v1341_v32, %v1230_v30 }
 0x8a6   :  { %v1519_v7 = vmul.f32 -1.442695, %v1343_v6  ;;  %v1351_v10 = vrot.slane %v1343_v6, 3 }
 0x8a8   :  { %1714 = vpow2.f32 %v1519_v7 }
 0x8b2   :  { %v1715_v8 = vpop.eup %1714 }
 0x8b3   :  { %v1347_v9 = vadd.f32 1.0, %v1715_v8 }
 0x8b5   :  { %1716 = vrcp.f32 %v1347_v9 }
 0x8b6   :  { %1718 = vtanh.f32 %v1351_v10 }
 0x8bf   :  { %v1717_v11 = vpop.eup %1716 }
 0x8c0   :  { %v1355_v38 = vrot.slane %v1717_v11, 1  ;;  %v1719_v12 = vpop.eup %1718  ;;  %v1361_v0 = vrot.slane %v1717_v11, 2 }
 0x8c1   :  { %v1358_v14 = vmul.f32 %v1719_v12, %v1717_v11 }
 0x8c2   :  { %v1357_v13 = vmul.f32 %v1355_v38, %v2343_v1 }
 0x8c4   :  { %v1359_v15 = vadd.f32 %v1358_v14, %v1357_v13 }
 0x8c6   :  { %1720 = vtanh.f32 %v1359_v15 }
 0x8d0   :  { %v1721_v50 = vpop.eup %1720 }
 0x8d1   :  { %v1363_v16 = vmul.f32 %v1721_v50, %v1361_v0 }
 0x8d3   :  { %1570 = vmatmul.mubr.f32.vlgmr.msra.gmra.mrb[32].mxu0 %v1363_v16 }
 0x9a6   :  { %v1447_v18 = vpop.f32.mrb[32].mxu0 }
 0x9a7   :  { %v1448_v57 = vadd.f32 %v1447_v18, %v1380_v42  ;;  %v1571_v36 = vpop.f32.mrb[33].mxu0 }
 0x9a9   :  { %v1454_v40 = vrot.slane %v1448_v57, %v1453_v17 }
 0x9ab   :  { %1455 = vst [vmem:[#allocation10] sm:$0xff] %v1454_v40 }
 0x9ac   :  { %1827 = shalt.err (!%p1824_p3)
}
 0x9ad   :  { %s1828_s5 = scalar_lea.hbm %s2375_s6, 128 }
 0x9ae   :  { %p1829_p4 = scmp.ne.s32.totalorder %s2375_s6, %s1828_s5  ;;  %p1832_p5 = scmp.lt.u32.totalorder %s1828_s5, %s2375_s6 }
 0x9b0   :  { %p1834_p6 = pnand %p1832_p5, %p1829_p4 }
 0x9b2   :  { %1837 = shalt.err (!%p1834_p6)
}
 0x9b3   :  { %1465 = dma.vmem_to_hbm [thread:$0]  %s1463_s7, 128, %s2375_s6, [#allocation4]  }
 0x9b4   :  { %1844 = dma.done.wait [#allocation4], 128  }
 0x9b5   :  { %1845 = vsyncadd [#allocation4], 4294967168 }
 0x9b6   :  { %1469 = vsyncpa [#allocation3], 1 }
 0x9b7   :  { %1470 = vsyncpa [#allocation8], 1 }
 0x9b8   :  { %1471 = vsyncpa [#allocation4], 1 }
 0x9b9   :  { %1472 = vsyncpa [#allocation5], 1 }

</bundles_post_ra>
